<compile_context>
chip_gen: v7x
topology: tpu7x:2x2x1
jax: 0.10.0
libtpu: 0.0.40
codegen_flags: <defaults>
</compile_context>

<pallas_src>
import jax
import jax.numpy as jnp
from jax import lax
from jax.experimental import pallas as pl
from jax.experimental.pallas import tpu as pltpu

EPS = 1.1920928955078125e-07   # torch.finfo(torch.float32).eps (F.rms_norm default)
ATTN_SCALE = 0.12
NEG = -1e30                    # plain Python float -> jaxpr literal (NOT a captured const)
VMEM_LIMIT = 64 * 1024 * 1024


def _rms_norm(x):
    return x * lax.rsqrt(jnp.mean(x * x, axis=-1, keepdims=True) + EPS)


def _matmul_t(x, w):
    # x: [M, K], w: [N, K] -> x @ w.T (F.linear); f32 accumulation on the MXU.
    return lax.dot_general(x, w, (((1,), (1,)), ((), ())),
                           preferred_element_type=jnp.float32)


# ----------------- call 1: prepass (mix + norm + qkv + rope + value mix) -----------------

def _make_prepass_kernel(H, hd, has_ve, compute_dtype):
    half = hd // 2
    Hhd = H * hd

    def kernel(lam_ref, lv_ref, x_ref, x0_ref, cos_ref, sin_ref, wqkv_ref, *rest):
        if has_ve:
            ve_ref, mixed_ref, q_ref, k_ref, v_ref = rest
        else:
            mixed_ref, q_ref, k_ref, v_ref = rest
            ve_ref = None

        mixed = lam_ref[0] * x_ref[...] + lam_ref[1] * x0_ref[...]
        mixed_ref[...] = mixed
        xn = _rms_norm(mixed).astype(compute_dtype)
        qkv = _matmul_t(xn, wqkv_ref[...])                 # [tp, 3*H*hd], f32 accum
        cos = cos_ref[...]                                 # [tp, hd]  = [cos, cos]
        sin = sin_ref[...]                                 # [tp, hd]  = [sin, -sin]

        def rope(z):                                       # roll(z, hd/2) == [z2, z1]
            return z * cos + pltpu.roll(z, half, axis=1) * sin

        for h in range(H):
            sl = slice(h * hd, (h + 1) * hd)
            qh = rope(_rms_norm(qkv[:, sl])) * ATTN_SCALE  # fold attention scale into q
            kh = rope(_rms_norm(qkv[:, Hhd + h * hd:Hhd + (h + 1) * hd]))
            vh = lv_ref[0] * qkv[:, 2 * Hhd + h * hd:2 * Hhd + (h + 1) * hd]
            if has_ve:
                vh = vh + lv_ref[1] * ve_ref[:, sl]
            q_ref[:, sl] = qh.astype(compute_dtype)
            k_ref[:, sl] = kh.astype(compute_dtype)
            v_ref[:, sl] = vh.astype(compute_dtype)

    return kernel


# ------------- call 2: flash causal attention (all heads) + c_proj + fused MLP -------------

def _make_attn_mlp_kernel(H, hd, tq, tk, compute_dtype):
    approx = compute_dtype != jnp.float32

    def kernel(mixed_ref, q_ref, k_ref, v_ref, wproj_ref, wfc_ref, wmproj_ref,
               o_ref, m_sc, l_sc, acc_sc):
        qi = pl.program_id(0)
        ki = pl.program_id(1)
        q_start = qi * tq
        k_start = ki * tk
        last_ki = (q_start + tq - 1) // tk   # last kv tile intersecting the causal region

        @pl.when(ki == 0)
        def _():
            m_sc[...] = jnp.full(m_sc.shape, NEG, jnp.float32)
            l_sc[...] = jnp.zeros(l_sc.shape, jnp.float32)
            acc_sc[...] = jnp.zeros(acc_sc.shape, jnp.float32)

        def flash_update(apply_mask):
            # NOTE(correctness): relies on kv iteration starting at ki == 0 (column 0 is
            # causally visible for every row), so m_sc is finite before any masked tile
            # is processed and exp(NEG - m) underflows to exactly 0 for masked entries.
            if apply_mask:
                rows = q_start + lax.broadcasted_iota(jnp.int32, (tq, tk), 0)
                cols = k_start + lax.broadcasted_iota(jnp.int32, (tq, tk), 1)
                keep = rows >= cols
            for h in range(H):
                sl = slice(h * hd, (h + 1) * hd)
                hc = slice(h, h + 1)
                s = lax.dot_general(q_ref[:, sl], k_ref[:, sl],
                                    (((1,), (1,)), ((), ())),
                                    preferred_element_type=jnp.float32)      # [tq, tk]
                if apply_mask:
                    s = jnp.where(keep, s, NEG)
                m_prev = m_sc[:, hc]
                m_new = jnp.maximum(m_prev, jnp.max(s, axis=-1, keepdims=True))
                alpha = jnp.exp(m_prev - m_new)
                p = jnp.exp(s - m_new)
                l_sc[:, hc] = alpha * l_sc[:, hc] + jnp.sum(p, axis=-1, keepdims=True)
                acc_sc[:, sl] = alpha * acc_sc[:, sl] + lax.dot_general(
                    p.astype(compute_dtype), v_ref[:, sl],
                    (((1,), (0,)), ((), ())), preferred_element_type=jnp.float32)
                m_sc[:, hc] = m_new

        # Fully-below-diagonal tiles need no mask; only diagonal-crossing tiles do.
        fully_visible = (k_start + tk - 1) <= q_start
        crossing = (k_start < q_start + tq) & ((k_start + tk - 1) > q_start)

        @pl.when(fully_visible)
        def _():
            flash_update(False)

        @pl.when(crossing)
        def _():
            flash_update(True)

        @pl.when(ki == last_ki)
        def _():
            parts = []
            for h in range(H):
                inv_l = pl.reciprocal(l_sc[:, h:h + 1], approx=approx)
                parts.append(acc_sc[:, h * hd:(h + 1) * hd] * inv_l)
            y = jnp.concatenate(parts, axis=1).astype(compute_dtype)         # [tq, H*hd]
            x_attn = mixed_ref[...] + _matmul_t(y, wproj_ref[...])           # + c_proj
            # Fused MLP epilogue: x + c_proj(relu(c_fc(rms_norm(x)))^2)
            hmid = _matmul_t(_rms_norm(x_attn).astype(compute_dtype), wfc_ref[...])
            hmid = jnp.square(jnp.maximum(hmid, 0.0)).astype(compute_dtype)
            o_ref[...] = x_attn + _matmul_t(hmid, wmproj_ref[...])

    return kernel


# ----------------------- no-attention layer: mix + norm + MLP + residual -----------------------

def _make_mix_mlp_kernel(compute_dtype):
    def kernel(lam_ref, x_ref, x0_ref, wfc_ref, wmproj_ref, o_ref):
        mixed = lam_ref[0] * x_ref[...] + lam_ref[1] * x0_ref[...]
        h = _matmul_t(_rms_norm(mixed).astype(compute_dtype), wfc_ref[...])
        h = jnp.square(jnp.maximum(h, 0.0)).astype(compute_dtype)
        o_ref[...] = mixed + _matmul_t(h, wmproj_ref[...])
    return kernel


# ------------------------------------------ wrapper ------------------------------------------

def _pick_tile(T, requested):
    t = min(requested, T)
    # Leave >=2 steps on the parallel grid axis so both v7x TensorCores get work.
    if T // t < 2 and T % 16 == 0:
        t = T // 2
    assert T % t == 0 and t % 8 == 0, (T, t)
    return t


def block_forward(x, ve, x0, params, *, q_tile=256, kv_tile=256, row_tile=256,
                  compute_dtype=jnp.bfloat16):
    B, T, D = x.shape
    assert B == 1, "Must use batch size = 1 (FlexAttention constraint in the reference)"
    H, hd = params["num_heads"], params["head_dim"]
    Hhd = H * hd

    xs, x0s = x[0], x0[0]
    wfc = params["mlp"]["c_fc_w"].astype(compute_dtype)      # compute-dtype weights
    wmp = params["mlp"]["c_proj_w"].astype(compute_dtype)    # (halves weight DMA in bf16)
    hdim_mlp = wfc.shape[0]
    smem = pl.BlockSpec(memory_space=pltpu.MemorySpace.SMEM)
    attn = params["attn"]

    if attn is None:
        tm = _pick_tile(T, row_tile)
        out = pl.pallas_call(
            _make_mix_mlp_kernel(compute_dtype),
            grid=(T // tm,),
            out_shape=jax.ShapeDtypeStruct((T, D), jnp.float32),
            in_specs=[smem,
                      pl.BlockSpec((tm, D), lambda i: (i, 0)),
                      pl.BlockSpec((tm, D), lambda i: (i, 0)),
                      pl.BlockSpec((hdim_mlp, D), lambda i: (0, 0)),
                      pl.BlockSpec((D, hdim_mlp), lambda i: (0, 0))],
            out_specs=pl.BlockSpec((tm, D), lambda i: (i, 0)),
            compiler_params=pltpu.CompilerParams(
                dimension_semantics=("parallel",), vmem_limit_bytes=VMEM_LIMIT),
        )(params["block_lambdas"], xs, x0s, wfc, wmp)
        return out[None]

    # ---- call 1: prepass -> mixed residual + q (scaled/roped), k (roped), v (value-mixed)
    tp = _pick_tile(T, row_tile)
    has_ve = ve is not None
    wqkv = attn["qkv_flat"].astype(compute_dtype)            # [3*H*hd, D]

    prepass_in_specs = [
        smem, smem,
        pl.BlockSpec((tp, D), lambda i: (i, 0)),             # x
        pl.BlockSpec((tp, D), lambda i: (i, 0)),             # x0
        pl.BlockSpec((tp, hd), lambda i: (i, 0)),            # cos table [cos, cos]
        pl.BlockSpec((tp, hd), lambda i: (i, 0)),            # sin table [sin, -sin]
        pl.BlockSpec((3 * Hhd, D), lambda i: (0, 0)),        # fused qkv weight (resident)
    ]
    prepass_args = [params["block_lambdas"], attn["attn_lambdas"], xs, x0s,
                    attn["cos_full"], attn["sin_signed"], wqkv]
    if has_ve:
        prepass_in_specs.append(pl.BlockSpec((tp, Hhd), lambda i: (i, 0)))
        prepass_args.append(ve[0])

    mixed, q, k, v = pl.pallas_call(
        _make_prepass_kernel(H, hd, has_ve, compute_dtype),
        grid=(T // tp,),
        out_shape=(jax.ShapeDtypeStruct((T, D), jnp.float32),
                   jax.ShapeDtypeStruct((T, Hhd), compute_dtype),
                   jax.ShapeDtypeStruct((T, Hhd), compute_dtype),
                   jax.ShapeDtypeStruct((T, Hhd), compute_dtype)),
        in_specs=prepass_in_specs,
        out_specs=(pl.BlockSpec((tp, D), lambda i: (i, 0)),
                   pl.BlockSpec((tp, Hhd), lambda i: (i, 0)),
                   pl.BlockSpec((tp, Hhd), lambda i: (i, 0)),
                   pl.BlockSpec((tp, Hhd), lambda i: (i, 0))),
        compiler_params=pltpu.CompilerParams(
            dimension_semantics=("parallel",), vmem_limit_bytes=VMEM_LIMIT),
    )(*prepass_args)

    # ---- call 2: flash attention (heads folded) + c_proj + fused MLP epilogue
    tq = _pick_tile(T, q_tile)
    tk = _pick_tile(T, kv_tile)
    nq, nk = T // tq, T // tk
    wproj = attn["c_proj_w"].astype(compute_dtype)           # [D, H*hd]

    def q_rows(qi, ki):
        return (qi, 0)

    def kv_rows(qi, ki):
        # Clamp above-diagonal tiles to the last needed block so the pipeline does not
        # DMA kv tiles whose compute is skipped by the causal pl.when (block index
        # unchanged -> copy elided).
        return (jnp.minimum(ki, (qi * tq + tq - 1) // tk), 0)

    def whole(qi, ki):
        return (0, 0)

    out = pl.pallas_call(
        _make_attn_mlp_kernel(H, hd, tq, tk, compute_dtype),
        grid=(nq, nk),
        out_shape=jax.ShapeDtypeStruct((T, D), jnp.float32),
        in_specs=[pl.BlockSpec((tq, D), q_rows),              # mixed residual (q rows)
                  pl.BlockSpec((tq, Hhd), q_rows),            # q (all heads)
                  pl.BlockSpec((tk, Hhd), kv_rows),           # k (all heads)
                  pl.BlockSpec((tk, Hhd), kv_rows),           # v (all heads)
                  pl.BlockSpec((D, Hhd), whole),              # attn c_proj (resident)
                  pl.BlockSpec((hdim_mlp, D), whole),         # mlp c_fc   (resident)
                  pl.BlockSpec((D, hdim_mlp), whole)],        # mlp c_proj (resident)
        out_specs=pl.BlockSpec((tq, D), q_rows),
        scratch_shapes=[pltpu.VMEM((tq, H), jnp.float32),     # running max  (per head)
                        pltpu.VMEM((tq, H), jnp.float32),     # running denom (per head)
                        pltpu.VMEM((tq, Hhd), jnp.float32)],  # output accumulator
        compiler_params=pltpu.CompilerParams(
            dimension_semantics=("parallel", "arbitrary"), vmem_limit_bytes=VMEM_LIMIT),
    )(mixed, q, k, v, wproj, wfc, wmp)
    return out[None]


# ----------------------------------- params / reference -----------------------------------

def init_params(key, dim, num_heads, head_dim, max_seq_len, layer_idx):
    ks = jax.random.split(key, 4)
    hdim = num_heads * head_dim

    def casted_linear(k, out_f, in_f):
        bound = (3.0 ** 0.5) * 0.5 * in_f ** -0.5
        return jax.random.uniform(k, (out_f, in_f), jnp.float32, -bound, bound)

    params = {
        "num_heads": num_heads,
        "head_dim": head_dim,
        # torch __init__ uses [1.0, 0.0]; nonzero values here so the x0 path is exercised
        "block_lambdas": jnp.array([0.8, 0.2], jnp.float32),
        "mlp": {
            "c_fc_w": casted_linear(ks[0], 4 * dim, dim),
            # torch zero-inits c_proj; deterministic random here so the output is nontrivial
            "c_proj_w": casted_linear(ks[1], dim, 4 * dim),
        },
        "attn": None,
    }
    if layer_idx != 7:
        bound = (3.0 ** 0.5) * 0.5 * dim ** -0.5
        qkv_w = jax.random.uniform(ks[2], (3, hdim, dim), jnp.float32, -bound, bound)
        angular_freq = (1.0 / 1024) ** jnp.linspace(0.0, 1.0, head_dim // 4, dtype=jnp.float32)
        angular_freq = jnp.concatenate([angular_freq, jnp.zeros(head_dim // 4, jnp.float32)])
        t = jnp.arange(max_seq_len, dtype=jnp.float32)
        theta = jnp.einsum("i,j->ij", t, angular_freq)
        cos, sin = jnp.cos(theta), jnp.sin(theta)                        # [S, hd//2]
        params["attn"] = {
            # raw parameters (used by the pure-JAX reference)
            "qkv_w": qkv_w, "cos": cos, "sin": sin,
            "attn_lambdas": jnp.array([0.5, 0.5], jnp.float32),
            "c_proj_w": casted_linear(ks[3], dim, hdim),                 # [D, H*hd]
            # kernel-side preprocessing (done ONCE at init, not per forward call)
            "qkv_flat": qkv_w.reshape(3 * hdim, dim),                    # [3*H*hd, D]
            "cos_full": jnp.concatenate([cos, cos], axis=-1),            # [S, hd]
            "sin_signed": jnp.concatenate([sin, -sin], axis=-1),         # [S, hd]
        }
    return params


def block_reference(x, ve, x0, params):
    """Pure-JAX reference mirroring the PyTorch forward (f32, highest precision)."""
    P = "highest"

    def rms(z):
        return z * lax.rsqrt(jnp.mean(z * z, axis=-1, keepdims=True) + EPS)

    lam = params["block_lambdas"]
    x = lam[0] * x + lam[1] * x0
    a = params["attn"]
    if a is not None:
        B, T, D = x.shape
        H, hd = params["num_heads"], params["head_dim"]
        xn = rms(x)
        qkv = jnp.einsum("btd,od->bto", xn, a["qkv_w"].reshape(3 * H * hd, D), precision=P)
        qkv = qkv.reshape(B, T, 3 * H, hd)
        q, k, v = qkv[:, :, :H], qkv[:, :, H:2 * H], qkv[:, :, 2 * H:]
        q, k = rms(q), rms(k)
        cos = a["cos"][:T][None, :, None, :]
        sin = a["sin"][:T][None, :, None, :]

        def rope(z):
            z1, z2 = jnp.split(z, 2, axis=-1)
            return jnp.concatenate([z1 * cos + z2 * sin, -z1 * sin + z2 * cos], axis=-1)

        q, k = rope(q), rope(k)
        lv = a["attn_lambdas"]
        v = lv[0] * v + (lv[1] * ve.reshape(v.shape) if ve is not None else 0.0)
        s = jnp.einsum("bqhd,bkhd->bhqk", q, k, precision=P) * ATTN_SCALE
        mask = jnp.tril(jnp.ones((T, T), dtype=bool))
        s = jnp.where(mask, s, -jnp.inf)
        p = jax.nn.softmax(s, axis=-1)
        y = jnp.einsum("bhqk,bkhd->bqhd", p, v, precision=P).reshape(B, T, H * hd)
        x = x + jnp.einsum("bto,do->btd", y, a["c_proj_w"], precision=P)
    xn = rms(x)
    h = jnp.einsum("btd,od->bto", xn, params["mlp"]["c_fc_w"], precision=P)
    h = jnp.square(jnp.maximum(h, 0.0))
    x = x + jnp.einsum("bto,do->btd", h, params["mlp"]["c_proj_w"], precision=P)
    return x


if __name__ == "__main__":
    # head_dim=128 is hard-coded in the module; dim kept a multiple of 128 (lane dense).
    dim, num_heads, head_dim, T = 128, 2, 128, 128
    key = jax.random.PRNGKey(0)
    kp, kx, kv, k0 = jax.random.split(key, 4)

    x = jax.random.normal(kx, (1, T, dim), jnp.float32)
    x0 = jax.random.normal(k0, (1, T, dim), jnp.float32)
    ve = jax.random.normal(kv, (1, T, num_heads * head_dim), jnp.float32)

    TOL_F32 = 1e-2    # f32 compute path: flash softmax vs dense f32 reference
    TOL_BF16 = 0.3    # bf16 fast path: loose sanity bound (bf16 operand rounding)

    # 1) attention layer with value embeddings (f32 validation path)
    p0 = init_params(kp, dim, num_heads, head_dim, T, layer_idx=0)
    ref = jax.block_until_ready(block_reference(x, ve, x0, p0))
    out = jax.block_until_ready(block_forward(x, ve, x0, p0, compute_dtype=jnp.float32))
    assert out.shape == x.shape and out.dtype == x.dtype
    err = float(jnp.max(jnp.abs(out - ref)))
    assert err < TOL_F32, f"attn+ve (f32) max abs error {err}"

    # 2) attention layer without value embeddings (ve is None path, f32)
    out2 = jax.block_until_ready(block_forward(x, None, x0, p0, compute_dtype=jnp.float32))
    ref2 = jax.block_until_ready(block_reference(x, None, x0, p0))
    err2 = float(jnp.max(jnp.abs(out2 - ref2)))
    assert err2 < TOL_F32, f"attn no-ve (f32) max abs error {err2}"

    # 3) layer without attention (layer_idx == 7): single fused mix+norm+MLP call (f32)
    p7 = init_params(kp, dim, num_heads, head_dim, T, layer_idx=7)
    out3 = jax.block_until_ready(block_forward(x, None, x0, p7, compute_dtype=jnp.float32))
    ref3 = jax.block_until_ready(block_reference(x, None, x0, p7))
    err3 = float(jnp.max(jnp.abs(out3 - ref3)))
    assert err3 < TOL_F32, f"no-attn (f32) max abs error {err3}"

    # 4) default (bf16 matmul operands, f32 accumulation) fast path
    out4 = jax.block_until_ready(block_forward(x, ve, x0, p0))
    err4 = float(jnp.max(jnp.abs(out4 - ref)))
    assert err4 < TOL_BF16, f"attn+ve (bf16) max abs error {err4}"

    print("KERNEL_OK")
</pallas_src>

<mosaic_0001>
module attributes {stable_mosaic.version = 11 : i64} {
  func.func @kernel(%arg0: i32, %arg1: memref<2xf32, #tpu.memory_space<smem>>, %arg2: memref<2xf32, #tpu.memory_space<smem>>, %arg3: memref<64x128xf32, #tpu.memory_space<vmem>>, %arg4: memref<64x128xf32, #tpu.memory_space<vmem>>, %arg5: memref<64x128xf32, #tpu.memory_space<vmem>>, %arg6: memref<64x128xf32, #tpu.memory_space<vmem>>, %arg7: memref<768x128xf32, #tpu.memory_space<vmem>>, %arg8: memref<64x256xf32, #tpu.memory_space<vmem>>, %arg9: memref<64x128xf32, #tpu.memory_space<vmem>>, %arg10: memref<64x256xf32, #tpu.memory_space<vmem>>, %arg11: memref<64x256xf32, #tpu.memory_space<vmem>>, %arg12: memref<64x256xf32, #tpu.memory_space<vmem>>) attributes {dimension_semantics = [#tpu.dimension_semantics<parallel>], iteration_bounds = array<i64: 2>, scalar_prefetch = 0 : i64, scratch_operands = 0 : i64, tpu.core_type = #tpu.core_type<tc>, window_params = [{transform_indices = @transform_0, window_bounds = array<i64: 2>}, {transform_indices = @transform_1, window_bounds = array<i64: 2>}, {transform_indices = @transform_2, window_bounds = array<i64: 64, 128>}, {transform_indices = @transform_3, window_bounds = array<i64: 64, 128>}, {transform_indices = @transform_4, window_bounds = array<i64: 64, 128>}, {transform_indices = @transform_5, window_bounds = array<i64: 64, 128>}, {pipeline_mode = #tpu.pipeline_mode<synchronous>, transform_indices = @transform_6, window_bounds = array<i64: 768, 128>}, {transform_indices = @transform_7, window_bounds = array<i64: 64, 256>}, {transform_indices = @transform_8, window_bounds = array<i64: 64, 128>}, {transform_indices = @transform_9, window_bounds = array<i64: 64, 256>}, {transform_indices = @transform_10, window_bounds = array<i64: 64, 256>}, {transform_indices = @transform_11, window_bounds = array<i64: 64, 256>}]} {
    %c0 = arith.constant 0 : index
    %0 = memref.load %arg1[%c0] : memref<2xf32, #tpu.memory_space<smem>>
    %c0_0 = arith.constant 0 : index
    %c0_1 = arith.constant 0 : index
    %1 = vector.load %arg3[%c0_0, %c0_1] : memref<64x128xf32, #tpu.memory_space<vmem>>, vector<64x128xf32>
    %2 = vector.broadcast %0 : f32 to vector<64x128xf32>
    %3 = arith.mulf %2, %1 : vector<64x128xf32>
    %c1 = arith.constant 1 : index
    %4 = memref.load %arg1[%c1] : memref<2xf32, #tpu.memory_space<smem>>
    %c0_2 = arith.constant 0 : index
    %c0_3 = arith.constant 0 : index
    %5 = vector.load %arg4[%c0_2, %c0_3] : memref<64x128xf32, #tpu.memory_space<vmem>>, vector<64x128xf32>
    %6 = vector.broadcast %4 : f32 to vector<64x128xf32>
    %7 = arith.mulf %6, %5 : vector<64x128xf32>
    %8 = arith.addf %3, %7 : vector<64x128xf32>
    %c0_4 = arith.constant 0 : index
    %c0_5 = arith.constant 0 : index
    %9 = vector.load %arg9[%c0_4, %c0_5] : memref<64x128xf32, #tpu.memory_space<vmem>>, vector<64x128xf32>
    tpu.vector_store %arg9[%c0_4, %c0_5], %8 {strides = array<i32>} : memref<64x128xf32, #tpu.memory_space<vmem>>, vector<64x128xf32>,
    %10 = arith.mulf %8, %8 : vector<64x128xf32>
    %cst = arith.constant dense<0.000000e+00> : vector<64xf32>
    %11 = vector.multi_reduction <add>, %10, %cst [1] : vector<64x128xf32> to vector<64xf32>
    %12 = vector.shape_cast %11 : vector<64xf32> to vector<64x1xf32>
    %cst_6 = arith.constant 1.280000e+02 : f32
    %13 = vector.broadcast %cst_6 : f32 to vector<64x1xf32>
    %14 = arith.divf %12, %13 : vector<64x1xf32>
    %cst_7 = arith.constant 1.1920929E-7 : f32
    %15 = vector.broadcast %cst_7 : f32 to vector<64x1xf32>
    %16 = arith.addf %14, %15 : vector<64x1xf32>
    %17 = math.rsqrt %16 : vector<64x1xf32>
    %18 = vector.broadcast %17 : vector<64x1xf32> to vector<64x128xf32>
    %19 = arith.mulf %8, %18 : vector<64x128xf32>
    %c0_8 = arith.constant 0 : index
    %c0_9 = arith.constant 0 : index
    %20 = vector.load %arg7[%c0_8, %c0_9] : memref<768x128xf32, #tpu.memory_space<vmem>>, vector<768x128xf32>
    %cst_10 = arith.constant dense<0.000000e+00> : vector<64x768xf32>
    %21 = tpu.matmul %19, %20, %cst_10 {dimension_numbers = #tpu.dot_dimension_numbers<[1], [1], [0], [0], [0, 0, 1, 0], [], []>} : vector<64x128xf32>, vector<768x128xf32>, vector<64x768xf32> -> vector<64x768xf32>
    %c0_11 = arith.constant 0 : index
    %c0_12 = arith.constant 0 : index
    %22 = vector.load %arg5[%c0_11, %c0_12] : memref<64x128xf32, #tpu.memory_space<vmem>>, vector<64x128xf32>
    %c0_13 = arith.constant 0 : index
    %c0_14 = arith.constant 0 : index
    %23 = vector.load %arg6[%c0_13, %c0_14] : memref<64x128xf32, #tpu.memory_space<vmem>>, vector<64x128xf32>
    %24 = vector.extract_strided_slice %21 {offsets = [0, 0], sizes = [64, 128], strides = [1, 1]} : vector<64x768xf32> to vector<64x128xf32>
    %25 = arith.mulf %24, %24 : vector<64x128xf32>
    %cst_15 = arith.constant dense<0.000000e+00> : vector<64xf32>
    %26 = vector.multi_reduction <add>, %25, %cst_15 [1] : vector<64x128xf32> to vector<64xf32>
    %27 = vector.shape_cast %26 : vector<64xf32> to vector<64x1xf32>
    %cst_16 = arith.constant 1.280000e+02 : f32
    %28 = vector.broadcast %cst_16 : f32 to vector<64x1xf32>
    %29 = arith.divf %27, %28 : vector<64x1xf32>
    %cst_17 = arith.constant 1.1920929E-7 : f32
    %30 = vector.broadcast %cst_17 : f32 to vector<64x1xf32>
    %31 = arith.addf %29, %30 : vector<64x1xf32>
    %32 = math.rsqrt %31 : vector<64x1xf32>
    %33 = vector.broadcast %32 : vector<64x1xf32> to vector<64x128xf32>
    %34 = arith.mulf %24, %33 : vector<64x128xf32>
    %35 = arith.mulf %34, %22 : vector<64x128xf32>
    %c64_i32 = arith.constant 64 : i32
    %36 = tpu.dynamic_rotate %34 by %c64_i32 dim 1 : vector<64x128xf32>, i32 -> vector<64x128xf32>
    %37 = arith.mulf %36, %23 : vector<64x128xf32>
    %38 = arith.addf %35, %37 : vector<64x128xf32>
    %cst_18 = arith.constant 1.200000e-01 : f32
    %39 = vector.broadcast %cst_18 : f32 to vector<64x128xf32>
    %40 = arith.mulf %38, %39 : vector<64x128xf32>
    %41 = vector.extract_strided_slice %21 {offsets = [0, 256], sizes = [64, 128], strides = [1, 1]} : vector<64x768xf32> to vector<64x128xf32>
    %42 = arith.mulf %41, %41 : vector<64x128xf32>
    %cst_19 = arith.constant dense<0.000000e+00> : vector<64xf32>
    %43 = vector.multi_reduction <add>, %42, %cst_19 [1] : vector<64x128xf32> to vector<64xf32>
    %44 = vector.shape_cast %43 : vector<64xf32> to vector<64x1xf32>
    %cst_20 = arith.constant 1.280000e+02 : f32
    %45 = vector.broadcast %cst_20 : f32 to vector<64x1xf32>
    %46 = arith.divf %44, %45 : vector<64x1xf32>
    %cst_21 = arith.constant 1.1920929E-7 : f32
    %47 = vector.broadcast %cst_21 : f32 to vector<64x1xf32>
    %48 = arith.addf %46, %47 : vector<64x1xf32>
    %49 = math.rsqrt %48 : vector<64x1xf32>
    %50 = vector.broadcast %49 : vector<64x1xf32> to vector<64x128xf32>
    %51 = arith.mulf %41, %50 : vector<64x128xf32>
    %52 = arith.mulf %51, %22 : vector<64x128xf32>
    %c64_i32_22 = arith.constant 64 : i32
    %53 = tpu.dynamic_rotate %51 by %c64_i32_22 dim 1 : vector<64x128xf32>, i32 -> vector<64x128xf32>
    %54 = arith.mulf %53, %23 : vector<64x128xf32>
    %55 = arith.addf %52, %54 : vector<64x128xf32>
    %c0_23 = arith.constant 0 : index
    %56 = memref.load %arg2[%c0_23] : memref<2xf32, #tpu.memory_space<smem>>
    %57 = vector.extract_strided_slice %21 {offsets = [0, 512], sizes = [64, 128], strides = [1, 1]} : vector<64x768xf32> to vector<64x128xf32>
    %58 = vector.broadcast %56 : f32 to vector<64x128xf32>
    %59 = arith.mulf %58, %57 : vector<64x128xf32>
    %c1_24 = arith.constant 1 : index
    %60 = memref.load %arg2[%c1_24] : memref<2xf32, #tpu.memory_space<smem>>
    %c0_25 = arith.constant 0 : index
    %c0_26 = arith.constant 0 : index
    %61 = vector.load %arg8[%c0_25, %c0_26] : memref<64x256xf32, #tpu.memory_space<vmem>>, vector<64x128xf32>
    %62 = vector.broadcast %60 : f32 to vector<64x128xf32>
    %63 = arith.mulf %62, %61 : vector<64x128xf32>
    %64 = arith.addf %59, %63 : vector<64x128xf32>
    %c0_27 = arith.constant 0 : index
    %c0_28 = arith.constant 0 : index
    %65 = vector.load %arg10[%c0_27, %c0_28] : memref<64x256xf32, #tpu.memory_space<vmem>>, vector<64x128xf32>
    tpu.vector_store %arg10[%c0_27, %c0_28], %40 {strides = array<i32>} : memref<64x256xf32, #tpu.memory_space<vmem>>, vector<64x128xf32>,
    %c0_29 = arith.constant 0 : index
    %c0_30 = arith.constant 0 : index
    %66 = vector.load %arg11[%c0_29, %c0_30] : memref<64x256xf32, #tpu.memory_space<vmem>>, vector<64x128xf32>
    tpu.vector_store %arg11[%c0_29, %c0_30], %55 {strides = array<i32>} : memref<64x256xf32, #tpu.memory_space<vmem>>, vector<64x128xf32>,
    %c0_31 = arith.constant 0 : index
    %c0_32 = arith.constant 0 : index
    %67 = vector.load %arg12[%c0_31, %c0_32] : memref<64x256xf32, #tpu.memory_space<vmem>>, vector<64x128xf32>
    tpu.vector_store %arg12[%c0_31, %c0_32], %64 {strides = array<i32>} : memref<64x256xf32, #tpu.memory_space<vmem>>, vector<64x128xf32>,
    %68 = vector.extract_strided_slice %21 {offsets = [0, 128], sizes = [64, 128], strides = [1, 1]} : vector<64x768xf32> to vector<64x128xf32>
    %69 = arith.mulf %68, %68 : vector<64x128xf32>
    %cst_33 = arith.constant dense<0.000000e+00> : vector<64xf32>
    %70 = vector.multi_reduction <add>, %69, %cst_33 [1] : vector<64x128xf32> to vector<64xf32>
    %71 = vector.shape_cast %70 : vector<64xf32> to vector<64x1xf32>
    %cst_34 = arith.constant 1.280000e+02 : f32
    %72 = vector.broadcast %cst_34 : f32 to vector<64x1xf32>
    %73 = arith.divf %71, %72 : vector<64x1xf32>
    %cst_35 = arith.constant 1.1920929E-7 : f32
    %74 = vector.broadcast %cst_35 : f32 to vector<64x1xf32>
    %75 = arith.addf %73, %74 : vector<64x1xf32>
    %76 = math.rsqrt %75 : vector<64x1xf32>
    %77 = vector.broadcast %76 : vector<64x1xf32> to vector<64x128xf32>
    %78 = arith.mulf %68, %77 : vector<64x128xf32>
    %79 = arith.mulf %78, %22 : vector<64x128xf32>
    %c64_i32_36 = arith.constant 64 : i32
    %80 = tpu.dynamic_rotate %78 by %c64_i32_36 dim 1 : vector<64x128xf32>, i32 -> vector<64x128xf32>
    %81 = arith.mulf %80, %23 : vector<64x128xf32>
    %82 = arith.addf %79, %81 : vector<64x128xf32>
    %cst_37 = arith.constant 1.200000e-01 : f32
    %83 = vector.broadcast %cst_37 : f32 to vector<64x128xf32>
    %84 = arith.mulf %82, %83 : vector<64x128xf32>
    %85 = vector.extract_strided_slice %21 {offsets = [0, 384], sizes = [64, 128], strides = [1, 1]} : vector<64x768xf32> to vector<64x128xf32>
    %86 = arith.mulf %85, %85 : vector<64x128xf32>
    %cst_38 = arith.constant dense<0.000000e+00> : vector<64xf32>
    %87 = vector.multi_reduction <add>, %86, %cst_38 [1] : vector<64x128xf32> to vector<64xf32>
    %88 = vector.shape_cast %87 : vector<64xf32> to vector<64x1xf32>
    %cst_39 = arith.constant 1.280000e+02 : f32
    %89 = vector.broadcast %cst_39 : f32 to vector<64x1xf32>
    %90 = arith.divf %88, %89 : vector<64x1xf32>
    %cst_40 = arith.constant 1.1920929E-7 : f32
    %91 = vector.broadcast %cst_40 : f32 to vector<64x1xf32>
    %92 = arith.addf %90, %91 : vector<64x1xf32>
    %93 = math.rsqrt %92 : vector<64x1xf32>
    %94 = vector.broadcast %93 : vector<64x1xf32> to vector<64x128xf32>
    %95 = arith.mulf %85, %94 : vector<64x128xf32>
    %96 = arith.mulf %95, %22 : vector<64x128xf32>
    %c64_i32_41 = arith.constant 64 : i32
    %97 = tpu.dynamic_rotate %95 by %c64_i32_41 dim 1 : vector<64x128xf32>, i32 -> vector<64x128xf32>
    %98 = arith.mulf %97, %23 : vector<64x128xf32>
    %99 = arith.addf %96, %98 : vector<64x128xf32>
    %c0_42 = arith.constant 0 : index
    %100 = memref.load %arg2[%c0_42] : memref<2xf32, #tpu.memory_space<smem>>
    %101 = vector.extract_strided_slice %21 {offsets = [0, 640], sizes = [64, 128], strides = [1, 1]} : vector<64x768xf32> to vector<64x128xf32>
    %102 = vector.broadcast %100 : f32 to vector<64x128xf32>
    %103 = arith.mulf %102, %101 : vector<64x128xf32>
    %c1_43 = arith.constant 1 : index
    %104 = memref.load %arg2[%c1_43] : memref<2xf32, #tpu.memory_space<smem>>
    %c0_44 = arith.constant 0 : index
    %c128 = arith.constant 128 : index
    %105 = vector.load %arg8[%c0_44, %c128] : memref<64x256xf32, #tpu.memory_space<vmem>>, vector<64x128xf32>
    %106 = vector.broadcast %104 : f32 to vector<64x128xf32>
    %107 = arith.mulf %106, %105 : vector<64x128xf32>
    %108 = arith.addf %103, %107 : vector<64x128xf32>
    %c0_45 = arith.constant 0 : index
    %c128_46 = arith.constant 128 : index
    %109 = vector.load %arg10[%c0_45, %c128_46] : memref<64x256xf32, #tpu.memory_space<vmem>>, vector<64x128xf32>
    tpu.vector_store %arg10[%c0_45, %c128_46], %84 {strides = array<i32>} : memref<64x256xf32, #tpu.memory_space<vmem>>, vector<64x128xf32>,
    %c0_47 = arith.constant 0 : index
    %c128_48 = arith.constant 128 : index
    %110 = vector.load %arg11[%c0_47, %c128_48] : memref<64x256xf32, #tpu.memory_space<vmem>>, vector<64x128xf32>
    tpu.vector_store %arg11[%c0_47, %c128_48], %99 {strides = array<i32>} : memref<64x256xf32, #tpu.memory_space<vmem>>, vector<64x128xf32>,
    %c0_49 = arith.constant 0 : index
    %c128_50 = arith.constant 128 : index
    %111 = vector.load %arg12[%c0_49, %c128_50] : memref<64x256xf32, #tpu.memory_space<vmem>>, vector<64x128xf32>
    tpu.vector_store %arg12[%c0_49, %c128_50], %108 {strides = array<i32>} : memref<64x256xf32, #tpu.memory_space<vmem>>, vector<64x128xf32>,
    return
  }
  func.func @transform_0(%arg0: i32) -> i32 {
    %c0_i32 = arith.constant 0 : i32
    %c0_i32_0 = arith.constant 0 : i32
    return %c0_i32 : i32
  }
  func.func @transform_1(%arg0: i32) -> i32 {
    %c0_i32 = arith.constant 0 : i32
    %c0_i32_0 = arith.constant 0 : i32
    return %c0_i32 : i32
  }
  func.func @transform_2(%arg0: i32) -> (i32, i32) {
    %c0_i32 = arith.constant 0 : i32
    %c0_i32_0 = arith.constant 0 : i32
    return %arg0, %c0_i32 : i32, i32
  }
  func.func @transform_3(%arg0: i32) -> (i32, i32) {
    %c0_i32 = arith.constant 0 : i32
    %c0_i32_0 = arith.constant 0 : i32
    return %arg0, %c0_i32 : i32, i32
  }
  func.func @transform_4(%arg0: i32) -> (i32, i32) {
    %c0_i32 = arith.constant 0 : i32
    %c0_i32_0 = arith.constant 0 : i32
    return %arg0, %c0_i32 : i32, i32
  }
  func.func @transform_5(%arg0: i32) -> (i32, i32) {
    %c0_i32 = arith.constant 0 : i32
    %c0_i32_0 = arith.constant 0 : i32
    return %arg0, %c0_i32 : i32, i32
  }
  func.func @transform_6(%arg0: i32) -> (i32, i32) {
    %c0_i32 = arith.constant 0 : i32
    %c0_i32_0 = arith.constant 0 : i32
    %c0_i32_1 = arith.constant 0 : i32
    return %c0_i32, %c0_i32_0 : i32, i32
  }
  func.func @transform_7(%arg0: i32) -> (i32, i32) {
    %c0_i32 = arith.constant 0 : i32
    %c0_i32_0 = arith.constant 0 : i32
    return %arg0, %c0_i32 : i32, i32
  }
  func.func @transform_8(%arg0: i32) -> (i32, i32) {
    %c0_i32 = arith.constant 0 : i32
    %c0_i32_0 = arith.constant 0 : i32
    return %arg0, %c0_i32 : i32, i32
  }
  func.func @transform_9(%arg0: i32) -> (i32, i32) {
    %c0_i32 = arith.constant 0 : i32
    %c0_i32_0 = arith.constant 0 : i32
    return %arg0, %c0_i32 : i32, i32
  }
  func.func @transform_10(%arg0: i32) -> (i32, i32) {
    %c0_i32 = arith.constant 0 : i32
    %c0_i32_0 = arith.constant 0 : i32
    return %arg0, %c0_i32 : i32, i32
  }
  func.func @transform_11(%arg0: i32) -> (i32, i32) {
    %c0_i32 = arith.constant 0 : i32
    %c0_i32_0 = arith.constant 0 : i32
    return %arg0, %c0_i32 : i32, i32
  }
}

</mosaic_0001>

<bundles_post_ra>
// kernel: tpu_custom_call.1
= control target key start
LH: loop header
LB: loop body
LE: loop exit
PB: predicated region body
PF: predicated region fallthrough
CT: control target
= control target key end

     0   :  { %s4215_s0 = inlined_call_operand.hbm [shape: f32[2], index: 0, kind: input, shape index: {}]   ;;  %s4216_s1 = inlined_call_operand.hbm [shape: f32[2], index: 1, kind: input, shape index: {}]   ;;  %s4217_s2 = inlined_call_operand.hbm [shape: f32[128,128], index: 2, kind: input, shape index: {}]   ;;  %s4218_s3 = inlined_call_operand.hbm [shape: f32[128,128], index: 3, kind: input, shape index: {}]   ;;  %s4219_s4 = inlined_call_operand.hbm [shape: f32[128,128], index: 4, kind: input, shape index: {}]   ;;  %s4220_s5 = inlined_call_operand.hbm [shape: f32[128,128], index: 5, kind: input, shape index: {}]   ;;  %s4221_s6 = inlined_call_operand.hbm [shape: f32[768,128], index: 6, kind: input, shape index: {}]   ;;  %s4222_s7 = inlined_call_operand.hbm [shape: f32[128,256], index: 7, kind: input, shape index: {}]   ;;  %s4223_s8 = inlined_call_operand.hbm [shape: f32[128,128], index: 8, kind: output, shape index: {0}]   ;;  %s4224_s9 = inlined_call_operand.hbm [shape: f32[128,256], index: 9, kind: output, shape index: {1}]   ;;  %s4225_s10 = inlined_call_operand.hbm [shape: f32[128,256], index: 10, kind: output, shape index: {2}]   ;;  %s4226_s11 = inlined_call_operand.hbm [shape: f32[128,256], index: 11, kind: output, shape index: {3}]  }
   0x1   :  { %4251 = sst [smem:[#allocation39_spill]] %s4218_s3 }
   0x2   :  { %4252 = sst [smem:[#allocation40_spill]] %s4221_s6 }
   0x3   :  { %4253 = sst [smem:[#allocation41_spill]] %s4223_s8 }
   0x4   :  { %4254 = sst [smem:[#allocation42_spill]] %s4224_s9 }
   0x5   :  { %4255 = sst [smem:[#allocation43_spill]] %s4225_s10 }
   0x6   :  { %4256 = sst [smem:[#allocation44_spill]] %s4226_s11 }
   0x7   :  { %17 = vsyncpa [#allocation5], 0 }
   0x8   :  { %18 = vsyncpa [#allocation7], 0 }
   0x9   :  { %19 = vsyncpa [#allocation3], 0 }
   0xa   :  { %21 = vsyncpa [#allocation3 + $0x1], 0 }
   0xb   :  { %22 = vsyncpa [#allocation10], 0 }
   0xc   :  { %24 = vsyncpa [#allocation10 + $0x1], 0 }
   0xd   :  { %25 = vsyncpa [#allocation13], 0 }
   0xe   :  { %27 = vsyncpa [#allocation13 + $0x1], 0 }
   0xf   :  { %28 = vsyncpa [#allocation16], 0 }
  0x10   :  { %30 = vsyncpa [#allocation16 + $0x1], 0 }
  0x11   :  { %31 = vsyncpa [#allocation4], 0 }
  0x12   :  { %33 = vsyncpa [#allocation4 + $0x1], 0 }
  0x13   :  { %34 = vsyncpa [#allocation19], 0 }
  0x14   :  { %36 = vsyncpa [#allocation19 + $0x1], 0 }
  0x15   :  { %37 = vsyncpa [#allocation22], 0 }
  0x16   :  { %39 = vsyncpa [#allocation22 + $0x1], 0  ;;  %s3077_s17 = smov 0   ;;  %s3079_s18 = smov 0  }
  0x17   :  { %s3081_s19 = smov 0   ;;  %s3083_s20 = smov 0  }
  0x18 LB: > { %4257 = sst [smem:[#allocation33_spill]] %s2982_s17  ;;  %s3098_s21 = sadd.s32 4294967295, %s2994_s20   ;;  %s2994_s20 = sphi %s3083_s20, %s4300_s20   ;;  %s2990_s19 = sphi %s3081_s19, %s4302_s19   ;;  %s2986_s18 = sphi %s3079_s18, %s4304_s18   ;;  %s2982_s17 = sphi %s3077_s17, %s4303_s17  }
  0x19   : > { %4258 = sst [smem:[#allocation34_spill]] %s2990_s19  ;;  %s4227_s22 = sadd.s32 4294967294, %s2994_s20  }
  0x1a   : > { %s3102_s23 = sadd.s32 1, %s2994_s20   ;;  %s94_s24 = sadd.s32 1, %s2990_s19 }
  0x1b   : > { %4259 = sst [smem:[#allocation35_spill]] %s3102_s23  ;;  %s91_s25 = ssub.s32 %s2994_s20, %s3102_s23 }
  0x1c   : > { %p101_p0 = scmp.ne.s32.totalorder %s2990_s19, %s2986_s18  ;;  %p92_p1 = scmp.eq.s32.totalorder %s91_s25, 0 }
  0x1d   : > { %p102_p2 = scmp.eq.s32.totalorder %s2994_s20, 0  ;;  %p107_p3 = scmp.ne.s32.totalorder %s2986_s18, %s2982_s17 }
  0x1e   : > { %p4233_p4 = scmp.eq.s32.totalorder %s3098_s21, 0  ;;  %p256_p7 = scmp.eq.s32.totalorder %s3098_s21, 1 }
  0x1f   : > { %s3114_s26 = scalar_select %p92_p1, %s2990_s19, %s94_s24  }
  0x20   : > { %p3116_p5 = por %p102_p2, %p101_p0  ;;  %p3122_p6 = por %p4233_p4, %p107_p3 }
  0x21   : > { %4260 = sst [smem:[#allocation36_spill]] %s3114_s26  ;;  %p262_p8 = scmp.eq.s32.totalorder %s4227_s22, 1 }
  0x22   : > { %s4261_s27 = scalar_select %p3116_p5, 1, 0 }
  0x23   : > { %s4262_s28 = scalar_select %p3122_p6, 1, 0 }
  0x24   : > { %p2084_p9 = scmp.ge.s32.totalorder %s2994_s20, 1  ;;  %p347_p10 = scmp.lt.s32.totalorder %s2994_s20, 3 }
  0x25   : > { %p3131_p11 = por %p256_p7, %p101_p0  ;;  %p3135_p12 = por %p262_p8, %p107_p3 }
  0x26   : > { %p3139_p13 = pnand %p2084_p9, %p347_p10  ;;  %s2996_s13 = smov [#allocation14]  }
  0x27   : > { %s4263_s29 = scalar_select %p3131_p11, 1, 0 }
  0x28   : > { %s4265_s30 = scalar_select %p3135_p12, 1, 0 }
  0x29   : > { %4264 = sst [smem:[#allocation37_spill]] %s4263_s29  ;;  %p2437_p1 = pneg %p3139_p13 }
  0x2a   : > { %4266 = sst [smem:[#allocation38_spill]] %s4265_s30  ;;  %s377_s14 = sshll.u32 %s2996_s13, 4  ;;  %s378_s14 = int_to_ptr.vmem [resolvable:$true] %s377_s14 }
  0x2b   : > { %s4267_s12 = scalar_select %p3139_p13, 1, 0 }
  0x2c   : > { %p3147_p2 = pnand %p2437_p1, %p4233_p4  ;;  %s3154_s16 = sand.u32 1, %s2990_s19  }
  0x2d   : > { %s3157_s24 = sshll.u32 %s3154_s16, 6  ;;  %s4269_s6 = sld [smem:[#allocation40_spill]] }
  0x2e   : > { %s4268_s15 = scalar_select %p3147_p2, 1, 0 }
  0x2f   : > { %p4244_p8 = pneg %p3147_p2 }
  0x33   : > { %s2608_s26 = scalar_lea.hbm %s4269_s6, 12288 }
  0x34   : > { %p2609_p7 = scmp.ne.s32.totalorder %s4269_s6, %s2608_s26  ;;  %p2615_p1 = scmp.lt.u32.totalorder %s2608_s26, %s4269_s6 }
  0x36   : > { %p2611_p9 = pnand %p4244_p8, %p2609_p7 }
  0x38   : > { %p2612_p10 = pneg %p2611_p9 }
  0x3a   : > { %p2617_p0 = pnand %p2615_p1, %p2612_p10 }
  0x3c   : > { %2620 = shalt.err (!%p2617_p0)
}
  0x3d   : > { %s2621_s17 = scalar_lea.vmem %s378_s14, 12288  ;;  %p2629_p11 = scmp.lt.s32.totalorder %s378_s14, %s378_s14 }
  0x3e   : > { %p2622_p4 = scmp.ne.s32.totalorder %s378_s14, %s2621_s17  ;;  %p2630_p6 = scmp.lt.s32.totalorder %s2621_s17, %s2621_s17 }
  0x40   : > { %p2624_p3 = pnand %p2622_p4, %p4244_p8  ;;  %p2631_p13 = por %p2630_p6, %p2629_p11 }
  0x42   : > { %p2625_p12 = pneg %p2624_p3 }
  0x44   : > { %p2632_p5 = pnand %p2631_p13, %p2625_p12 }
  0x46   : > { %2635 = shalt.err (!%p2632_p5)
}
  0x47   : > { %s4239_s22 = smov 128   ;;  %s4241_s19 = smov 8  }
  0x48   : > { %2446 = dma.hbm_to_vmem [thread:$0]  (!%p3147_p2), %s4269_s6, 12288, %s378_s14, [#allocation13], %s4239_s22, %s4239_s22, %s4241_s19  }
  0x49   : > { %s3185_s17 = sshll.u32 %s2994_s20, 10  ;;  %p4270_p4 = scmp.ne.s32.totalorder %s4261_s27, 0 }
  0x4a   : > { %p4271_p5 = scmp.lt.s32.totalorder %s2994_s20, 2  ;;  %s4243_s25 = sand.u32 1, %s2994_s20  }
  0x4b   : > { %s4273_s3 = sld [smem:[#allocation39_spill]]  ;;  %s416_s14 = scalar_lea.vmem [#allocation9], %s3157_s24 }
  0x4c   : > { %p3191_p6 = pnand %p4271_p5, %p4270_p4  ;;  %s423_s23 = sshll.u32 %s416_s14, 4  ;;  %s3203_s23 = int_to_ptr.vmem [resolvable:$true] %s423_s23 }
  0x4d   : > { %s3207_s27 = scalar_lea.sflag [#allocation10], %s4243_s25 }
  0x4e   : > { %p3213_p12 = pneg %p3191_p6 }
  0x51   : > { %s3200_s9 = scalar_lea.hbm %s4273_s3, %s3185_s17  ;;  %s2641_s14 = scalar_lea.hbm %s4273_s3, 2048 }
  0x52   : > { %s2636_s26 = scalar_lea.hbm %s3200_s9, 1024  ;;  %p2642_p3 = scmp.lt.u32.totalorder %s3200_s9, %s4273_s3 }
  0x53   : > { %p2637_p11 = scmp.ne.s32.totalorder %s3200_s9, %s2636_s26  ;;  %p2643_p7 = scmp.lt.u32.totalorder %s2641_s14, %s2636_s26 }
  0x54   : > { %p2645_p10 = scmp.lt.u32.totalorder %s2636_s26, %s3200_s9 }
  0x55   : > { %p2639_p13 = pnand %p3213_p12, %p2637_p11  ;;  %p2644_p9 = por %p2643_p7, %p2642_p3 }
  0x57   : > { %p2640_p0 = pneg %p2639_p13  ;;  %p2646_p1 = por %p2645_p10, %p2644_p9 }
  0x59   : > { %p2647_p4 = pnand %p2646_p1, %p2640_p0 }
  0x5b   : > { %2650 = shalt.err (!%p2647_p4)
}
  0x5c   : > { %s2651_s25 = scalar_lea.vmem %s3203_s23, 1024  ;;  %s2999_s10 = smov [#allocation9]  }
  0x5d   : > { %p2652_p5 = scmp.ne.s32.totalorder %s3203_s23, %s2651_s25  ;;  %s2656_s13 = sshll.u32 %s2999_s10, 4  ;;  %s2657_s13 = int_to_ptr.vmem [resolvable:$false] %s2656_s13 }
  0x5e   : > { %s2658_s6 = scalar_lea.vmem %s2657_s13, 2048  ;;  %p2659_p8 = scmp.lt.s32.totalorder %s3203_s23, %s2657_s13 }
  0x5f   : > { %p2654_p11 = pnand %p2652_p5, %p3213_p12  ;;  %p2660_p2 = scmp.lt.s32.totalorder %s2658_s6, %s2651_s25 }
  0x61   : > { %p2655_p13 = pneg %p2654_p11  ;;  %p2661_p3 = por %p2660_p2, %p2659_p8 }
  0x63   : > { %p2662_p7 = pnand %p2661_p3, %p2655_p13 }
  0x65   : > { %2665 = shalt.err (!%p2662_p7)
}
  0x66   : > { %s4275_s19 = smov 8   ;;  %s4276_s26 = smov 128  }
  0x67   : > { %2453 = dma.hbm_to_vmem [thread:$0]  (!%p3191_p6), %s3200_s9, 1024, %s3203_s23, %s3207_s27, %s4276_s26, %s4276_s26, %s4275_s19  }
  0x68   : > { %s2666_s10 = scalar_lea.hbm %s4215_s0, 16  ;;  %p4277_p8 = scmp.ne.s32.totalorder %s4268_s15, 0 }
  0x69   : > { %p2667_p2 = scmp.ne.s32.totalorder %s4215_s0, %s2666_s10  ;;  %p2673_p1 = scmp.lt.u32.totalorder %s2666_s10, %s4215_s0 }
  0x6a   : > { %p4278_p0 = pneg %p4277_p8 }
  0x6c   : > { %p2669_p9 = pnand %p2667_p2, %p4278_p0 }
  0x6e   : > { %p2670_p10 = pneg %p2669_p9 }
  0x70   : > { %p2675_p4 = pnand %p2673_p1, %p2670_p10 }
  0x72   : > { %2678 = shalt.err (!%p2675_p4)
}
  0x73   : > { %s3000_s8 = smov [#allocation2]   ;;  %s2679_s14 = scalar_lea.hbm %s4216_s1, 16 }
  0x74   : > { %2440 = dma.hbm_to_smem (!%p4277_p8), %s4215_s0, 16, %s3000_s8, [#allocation5]  }
  0x75   : > { %p2680_p5 = scmp.ne.s32.totalorder %s4216_s1, %s2679_s14  ;;  %p4279_p11 = pmov %p4278_p0 }
  0x76   : > { %p2686_p7 = scmp.lt.u32.totalorder %s2679_s14, %s4216_s1 }
  0x77   : > { %p2682_p13 = pnand %p2680_p5, %p4279_p11 }
  0x79   : > { %p2683_p3 = pneg %p2682_p13 }
  0x7b   : > { %p2688_p2 = pnand %p2686_p7, %p2683_p3 }
  0x7d   : > { %2691 = shalt.err (!%p2688_p2)
}
  0x7e   : > { %s3001_s6 = smov [#allocation6]   ;;  %s3278_s11 = scalar_lea.hbm %s4217_s2, %s3185_s17 }
  0x7f   : > { %2443 = dma.hbm_to_smem (!%p4277_p8), %s4216_s1, 16, %s3001_s6, [#allocation7]  }
  0x80   : > { %s395_s23 = scalar_lea.vmem [#allocation8], %s3157_s24  ;;  %s392_s15 = scalar_lea.sflag [#allocation3], %s3154_s16 }
  0x81   : > { %s402_s14 = sshll.u32 %s395_s23, 4  ;;  %s2692_s13 = scalar_lea.hbm %s3278_s11, 1024  ;;  %s3281_s14 = int_to_ptr.vmem [resolvable:$true] %s402_s14 }
  0x82   : > { %p2693_p0 = scmp.ne.s32.totalorder %s3278_s11, %s2692_s13  ;;  %s2697_s6 = scalar_lea.hbm %s4217_s2, 2048 }
  0x83   : > { %p2698_p8 = scmp.lt.u32.totalorder %s3278_s11, %s4217_s2  ;;  %p2699_p1 = scmp.lt.u32.totalorder %s2697_s6, %s2692_s13 }
  0x84   : > { %p2695_p9 = pnand %p2693_p0, %p3213_p12  ;;  %p2701_p5 = scmp.lt.u32.totalorder %s2692_s13, %s3278_s11 }
  0x85   : > { %p2700_p4 = por %p2699_p1, %p2698_p8 }
  0x86   : > { %p2696_p10 = pneg %p2695_p9 }
  0x87   : > { %p2702_p11 = por %p2701_p5, %p2700_p4 }
  0x89   : > { %p2703_p13 = pnand %p2702_p11, %p2696_p10 }
  0x8b   : > { %2706 = shalt.err (!%p2703_p13)
}
  0x8c   : > { %s2707_s29 = scalar_lea.vmem %s3281_s14, 1024  ;;  %s3002_s3 = smov [#allocation8]  }
  0x8d   : > { %p2708_p3 = scmp.ne.s32.totalorder %s3281_s14, %s2707_s29  ;;  %s2712_s23 = sshll.u32 %s3002_s3, 4  ;;  %s2713_s23 = int_to_ptr.vmem [resolvable:$false] %s2712_s23 }
  0x8e   : > { %s2714_s10 = scalar_lea.vmem %s2713_s23, 2048  ;;  %p2715_p0 = scmp.lt.s32.totalorder %s3281_s14, %s2713_s23 }
  0x8f   : > { %p2710_p7 = pnand %p2708_p3, %p3213_p12  ;;  %p2716_p9 = scmp.lt.s32.totalorder %s2714_s10, %s2707_s29 }
  0x91   : > { %p2711_p2 = pneg %p2710_p7  ;;  %p2717_p8 = por %p2716_p9, %p2715_p0 }
  0x93   : > { %p2718_p1 = pnand %p2717_p8, %p2711_p2 }
  0x95   : > { %2721 = shalt.err (!%p2718_p1)
}
  0x96   : > { %2450 = dma.hbm_to_vmem [thread:$0]  (!%p3191_p6), %s3278_s11, 1024, %s3281_s14, %s392_s15, %s4276_s26, %s4276_s26, %s4275_s19  }
  0x97   : > { %s3314_s6 = scalar_lea.hbm %s4219_s4, %s3185_s17  ;;  %s437_s8 = scalar_lea.vmem [#allocation11], %s3157_s24 }
  0x98   : > { %s444_s9 = sshll.u32 %s437_s8, 4  ;;  %s2722_s29 = scalar_lea.hbm %s3314_s6, 1024  ;;  %s3317_s9 = int_to_ptr.vmem [resolvable:$true] %s444_s9 }
  0x99   : > { %p2723_p10 = scmp.ne.s32.totalorder %s3314_s6, %s2722_s29  ;;  %s2727_s14 = scalar_lea.hbm %s4219_s4, 2048 }
  0x9a   : > { %p2728_p11 = scmp.lt.u32.totalorder %s3314_s6, %s4219_s4  ;;  %p2729_p13 = scmp.lt.u32.totalorder %s2727_s14, %s2722_s29 }
  0x9b   : > { %p2725_p4 = pnand %p2723_p10, %p3213_p12  ;;  %p2731_p7 = scmp.lt.u32.totalorder %s2722_s29, %s3314_s6 }
  0x9c   : > { %p2730_p3 = por %p2729_p13, %p2728_p11 }
  0x9d   : > { %p2726_p5 = pneg %p2725_p4 }
  0x9e   : > { %p2732_p2 = por %p2731_p7, %p2730_p3 }
  0xa0   : > { %p2733_p0 = pnand %p2732_p2, %p2726_p5 }
  0xa2   : > { %2736 = shalt.err (!%p2733_p0)
}
  0xa3   : > { %s2737_s10 = scalar_lea.vmem %s3317_s9, 1024  ;;  %s3003_s13 = smov [#allocation11]  }
  0xa4   : > { %p2738_p9 = scmp.ne.s32.totalorder %s3317_s9, %s2737_s10  ;;  %s2742_s25 = sshll.u32 %s3003_s13, 4  ;;  %s2743_s25 = int_to_ptr.vmem [resolvable:$false] %s2742_s25 }
  0xa5   : > { %s2744_s8 = scalar_lea.vmem %s2743_s25, 2048  ;;  %p2745_p10 = scmp.lt.s32.totalorder %s3317_s9, %s2743_s25 }
  0xa6   : > { %p2740_p8 = pnand %p2738_p9, %p3213_p12  ;;  %p2746_p4 = scmp.lt.s32.totalorder %s2744_s8, %s2737_s10 }
  0xa8   : > { %p2741_p1 = pneg %p2740_p8  ;;  %p2747_p11 = por %p2746_p4, %p2745_p10 }
  0xaa   : > { %p2748_p13 = pnand %p2747_p11, %p2741_p1 }
  0xac   : > { %2751 = shalt.err (!%p2748_p13)
}
  0xad   : > { %2456 = dma.hbm_to_vmem [thread:$0]  (!%p3191_p6), %s3314_s6, 1024, %s3317_s9, %s3207_s27, %s4276_s26, %s4276_s26, %s4275_s19  }
  0xae   : > { %s3348_s11 = scalar_lea.hbm %s4220_s5, %s3185_s17  ;;  %s458_s14 = scalar_lea.vmem [#allocation12], %s3157_s24 }
  0xaf   : > { %s465_s15 = sshll.u32 %s458_s14, 4  ;;  %s4280_s23 = sand.u32 1, %s2994_s20   ;;  %s3351_s15 = int_to_ptr.vmem [resolvable:$true] %s465_s15 }
  0xb0   : > { %s3355_s10 = scalar_lea.sflag [#allocation13], %s4280_s23  ;;  %s2752_s13 = scalar_lea.hbm %s3348_s11, 1024 }
  0xb1   : > { %p2753_p5 = scmp.ne.s32.totalorder %s3348_s11, %s2752_s13  ;;  %s2757_s17 = scalar_lea.hbm %s4220_s5, 2048 }
  0xb2   : > { %p2758_p2 = scmp.lt.u32.totalorder %s3348_s11, %s4220_s5  ;;  %p2759_p0 = scmp.lt.u32.totalorder %s2757_s17, %s2752_s13 }
  0xb3   : > { %p2755_p3 = pnand %p2753_p5, %p3213_p12  ;;  %p2761_p8 = scmp.lt.u32.totalorder %s2752_s13, %s3348_s11 }
  0xb4   : > { %p2760_p9 = por %p2759_p0, %p2758_p2 }
  0xb5   : > { %p2756_p7 = pneg %p2755_p3 }
  0xb6   : > { %p2762_p1 = por %p2761_p8, %p2760_p9 }
  0xb8   : > { %p2763_p10 = pnand %p2762_p1, %p2756_p7 }
  0xba   : > { %2766 = shalt.err (!%p2763_p10)
}
  0xbb   : > { %s2767_s24 = scalar_lea.vmem %s3351_s15, 1024  ;;  %s3004_s8 = smov [#allocation12]  }
  0xbc   : > { %p2768_p4 = scmp.ne.s32.totalorder %s3351_s15, %s2767_s24  ;;  %s2772_s29 = sshll.u32 %s3004_s8, 4  ;;  %s2773_s29 = int_to_ptr.vmem [resolvable:$false] %s2772_s29 }
  0xbd   : > { %s2774_s3 = scalar_lea.vmem %s2773_s29, 2048  ;;  %p2775_p5 = scmp.lt.s32.totalorder %s3351_s15, %s2773_s29 }
  0xbe   : > { %p2770_p11 = pnand %p2768_p4, %p3213_p12  ;;  %p2776_p3 = scmp.lt.s32.totalorder %s2774_s3, %s2767_s24 }
  0xc0   : > { %p2771_p13 = pneg %p2770_p11  ;;  %p2777_p2 = por %p2776_p3, %p2775_p5 }
  0xc2   : > { %p2778_p0 = pnand %p2777_p2, %p2771_p13 }
  0xc4   : > { %2781 = shalt.err (!%p2778_p0)
}
  0xc5   : > { %2459 = dma.hbm_to_vmem [thread:$0]  (!%p3191_p6), %s3348_s11, 1024, %s3351_s15, %s3355_s10, %s4276_s26, %s4276_s26, %s4275_s19  }
  0xc6   : > { %s2101_s14 = sshll.u32 %s3154_s16, 7  ;;  %s2143_s23 = sshll.u32 %s2994_s20, 11 }
  0xc7   : > { %s3387_s6 = scalar_lea.hbm %s4222_s7, %s2143_s23  ;;  %s479_s17 = scalar_lea.vmem [#allocation15], %s2101_s14 }
  0xc8   : > { %s487_s9 = sshll.u32 %s479_s17, 4  ;;  %s476_s25 = scalar_lea.sflag [#allocation16], %s3154_s16  ;;  %s3389_s9 = int_to_ptr.vmem [resolvable:$true] %s487_s9 }
  0xc9   : > { %s2782_s24 = scalar_lea.hbm %s3387_s6, 2048  ;;  %s2787_s11 = scalar_lea.hbm %s4222_s7, 4096 }
  0xca   : > { %p2783_p7 = scmp.ne.s32.totalorder %s3387_s6, %s2782_s24  ;;  %p2788_p1 = scmp.lt.u32.totalorder %s3387_s6, %s4222_s7 }
  0xcb   : > { %p2789_p10 = scmp.lt.u32.totalorder %s2787_s11, %s2782_s24  ;;  %p2791_p11 = scmp.lt.u32.totalorder %s2782_s24, %s3387_s6 }
  0xcc   : > { %p2785_p9 = pnand %p2783_p7, %p3213_p12 }
  0xcd   : > { %p2790_p4 = por %p2789_p10, %p2788_p1 }
  0xce   : > { %p2786_p8 = pneg %p2785_p9 }
  0xcf   : > { %p2792_p13 = por %p2791_p11, %p2790_p4 }
  0xd1   : > { %p2793_p5 = pnand %p2792_p13, %p2786_p8 }
  0xd3   : > { %2796 = shalt.err (!%p2793_p5)
}
  0xd4   : > { %s2797_s8 = scalar_lea.vmem %s3389_s9, 2048  ;;  %s3005_s29 = smov [#allocation15]  }
  0xd5   : > { %p2798_p3 = scmp.ne.s32.totalorder %s3389_s9, %s2797_s8  ;;  %s2802_s3 = sshll.u32 %s3005_s29, 4  ;;  %s2803_s3 = int_to_ptr.vmem [resolvable:$false] %s2802_s3 }
  0xd6   : > { %s2804_s14 = scalar_lea.vmem %s2803_s3, 4096  ;;  %p2805_p7 = scmp.lt.s32.totalorder %s3389_s9, %s2803_s3 }
  0xd7   : > { %p2800_p2 = pnand %p2798_p3, %p3213_p12  ;;  %p2806_p9 = scmp.lt.s32.totalorder %s2804_s14, %s2797_s8 }
  0xd9   : > { %p2801_p0 = pneg %p2800_p2  ;;  %p2807_p1 = por %p2806_p9, %p2805_p7 }
  0xdb   : > { %p2808_p10 = pnand %p2807_p1, %p2801_p0 }
  0xdd   : > { %2811 = shalt.err (!%p2808_p10)
}
  0xde   : > { %s3006_s23 = smov 256   ;;  %s3007_s13 = smov 16  }
  0xdf   : > { %2462 = dma.hbm_to_vmem [thread:$0]  (!%p3191_p6), %s3387_s6, 2048, %s3389_s9, %s476_s25, %s3006_s23, %s3006_s23, %s3007_s13  }
  0xe0   : > { %p4281_p12 = scmp.ne.s32.totalorder %s4267_s12, 0 }
  0xe1   : > { %p4282_p8 = scmp.eq.s32.totalorder (!%p4281_p12), %s3098_s21, 0 }
  0xe2   : > { %499 = sbr.rel (%p4281_p12) target bundleno = 1037 (0x40d), region = 52 }
  0xe9   : > { %2941 = dma.done.wait (%p4282_p8), [#allocation5], 16   ;;  %p4283_p4 = pmov %p4282_p8 }
  0xeb   : > { %2943 = vsyncadd (%p4283_p4), [#allocation5], 4294967280  ;;  %p4284_p11 = pmov %p4283_p4 }
  0xec   : > { %p4285_p13 = pmov %p4283_p4 }
  0xed   : > { %2945 = dma.done.wait (%p4284_p11), [#allocation7], 16  }
  0xee   : > { %2947 = vsyncadd (%p4285_p13), [#allocation7], 4294967280  ;;  %s3426_s22 = sand.u32 1, %s2986_s18   ;;  %p4286_p6 = scmp.ne.s32.totalorder %s4262_s28, 0 }
  0xef   : > { %s3429_s12 = sshll.u32 %s3426_s22, 6  ;;  %s510_s16 = scalar_lea.sflag [#allocation3], %s3426_s22 }
  0xf0   : > { %s3433_s30 = scalar_lea.vmem [#allocation8], %s3429_s12 }
  0xf1   : > { %2949 = dma.done.wait (%p4286_p6), %s510_s16, 1024  }
  0xf2   : > { %2951 = vsyncadd (%p4286_p6), %s510_s16, 4294966272  ;;  %s3440_s27 = sand.u32 1, %s3098_s21   ;;  %s3444_s17 = scalar_lea.vmem [#allocation9], %s3429_s12 }
  0xf3   : > { %s519_s6 = scalar_lea.sflag [#allocation10], %s3440_s27 }
  0xf4   : > { %2953 = dma.done.wait (%p4286_p6), %s519_s6, 2048  }
  0xf5   : > { %2955 = vsyncadd (%p4286_p6), %s519_s6, 4294965248  ;;  %s3451_s9 = scalar_lea.vmem [#allocation11], %s3429_s12  ;;  %s537_s25 = scalar_lea.sflag [#allocation13], %s3440_s27 }
  0xf6   : > { %s3455_s24 = scalar_lea.vmem [#allocation12], %s3429_s12 }
  0xf7   : > { %2957 = dma.done.wait (%p4286_p6), %s537_s25, 1024  }
  0xf8   : > { %2959 = vsyncadd (%p4286_p6), %s537_s25, 4294966272  ;;  %p4287_p5 = pmov %p4283_p4 }
  0xf9   : > { %p4288_p3 = pmov %p4283_p4 }
  0xfa   : > { %2961 = dma.done.wait (%p4287_p5), [#allocation13], 12288  }
  0xfb   : > { %2963 = vsyncadd (%p4288_p3), [#allocation13], 4294955008  ;;  %s3466_s19 = sshll.u32 %s3426_s22, 7  ;;  %s550_s26 = scalar_lea.sflag [#allocation16], %s3426_s22 }
  0xfc   : > { %s3470_s11 = scalar_lea.vmem [#allocation15], %s3466_s19 }
  0xfd   : > { %2965 = dma.done.wait (%p4286_p6), %s550_s26, 2048  }
  0xfe   : > { %2967 = vsyncadd (%p4286_p6), %s550_s26, 4294965248 }
  0xff   : > { %558 = sfence }
 0x100   : > { %s637_s15 = sld [smem:[#allocation2]]  ;;  %s2118_s10 = sld [smem:[#allocation2 + $0x1]]  ;;  %v638_v0 = vld [vmem:[%s3433_s30] sm:$0xff]  ;;  %v639_v2 = vld [vmem:[%s3433_s30 + $0x8] sm:$0xff]  ;;  %v640_v4 = vld [vmem:[%s3433_s30 + $0x10] sm:$0xff] }
 0x101   : > { %v656_v1 = vld [vmem:[%s3444_s17] sm:$0xff]  ;;  %v657_v3 = vld [vmem:[%s3444_s17 + $0x8] sm:$0xff]  ;;  %v658_v5 = vld [vmem:[%s3444_s17 + $0x10] sm:$0xff]  ;;  %s3503_s28 = scalar_lea.vmem [#allocation17], %s3429_s12  ;;  %s2119_s8 = sld [smem:[#allocation6 + $0x1]] }
 0x102   : > { %v641_v6 = vld [vmem:[%s3433_s30 + $0x18] sm:$0xff]  ;;  %v642_v10 = vld [vmem:[%s3433_s30 + $0x20] sm:$0xff]  ;;  %v643_v16 = vld [vmem:[%s3433_s30 + $0x28] sm:$0xff]  ;;  %s1397_s29 = sld [smem:[#allocation6]]  ;;  %s3762_s3 = scalar_lea.vmem [#allocation21], %s3466_s19 }
 0x103   : > { %v659_v7 = vld [vmem:[%s3444_s17 + $0x18] sm:$0xff]  ;;  %v660_v11 = vld [vmem:[%s3444_s17 + $0x20] sm:$0xff]  ;;  %v661_v17 = vld [vmem:[%s3444_s17 + $0x28] sm:$0xff]  ;;  %s3008_s14 = smov 64   ;;  %s4289_s23 = sld [smem:[#allocation37_spill]] }
 0x104   : > { %v644_v18 = vld [vmem:[%s3433_s30 + $0x30] sm:$0xff]  ;;  %v645_v24 = vld [vmem:[%s3433_s30 + $0x38] sm:$0xff]  ;;  %v762_v30 = vld [vmem:[#allocation14 + $0x80] sm:$0xff]  ;;  %s3957_s13 = sshll.u32 %s3098_s21, 11  ;;  %s2144_s12 = sshll.u32 %s3098_s21, 10 }
 0x105   : > { %v662_v23 = vld [vmem:[%s3444_s17 + $0x30] sm:$0xff]  ;;  %v663_v25 = vld [vmem:[%s3444_s17 + $0x38] sm:$0xff]  ;;  %v763_v31 = vld [vmem:[#allocation14 + $0x88] sm:$0xff]  ;;  %s4290_s6 = sld [smem:[#allocation41_spill]]  ;;  %s1746_s25 = sshll.u32 %s3503_s28, 4  ;;  %s3971_s25 = int_to_ptr.vmem [resolvable:$true] %s1746_s25 }
 0x106   : > { %v646_v8 = vstv %s637_s15  ;;  %v664_v9 = vstv %s2118_s10  ;;  %v794_v32 = vld [vmem:[#allocation14 + $0x180] sm:$0xff]  ;;  %v795_v37 = vld [vmem:[#allocation14 + $0x188] sm:$0xff]  ;;  %v764_v45 = vld [vmem:[#allocation14 + $0x90] sm:$0xff]  ;;  %v2295_v55 = vpack.c.bf16 %v763_v31, %v762_v30  ;;  %s1718_s26 = scalar_lea.sflag [#allocation4], %s3426_s22  ;;  %s2812_s21 = scalar_lea.vmem %s3971_s25, 1024 }
 0x107   : > { %v647_v12 = vmul.f32 %v646_v8, %v638_v0  ;;  %v665_v13 = vmul.f32 %v664_v9, %v656_v1  ;;  %v648_v14 = vmul.f32 %v646_v8, %v639_v2  ;;  %v666_v15 = vmul.f32 %v664_v9, %v657_v3  ;;  %v746_v38 = vld [vmem:[#allocation14] sm:$0xff]  ;;  %v747_v39 = vld [vmem:[#allocation14 + $0x8] sm:$0xff]  ;;  %v765_v49 = vld [vmem:[#allocation14 + $0x98] sm:$0xff]  ;;  %p2813_p2 = scmp.ne.s32.totalorder %s3971_s25, %s2812_s21 }
 0x108   : > { %v649_v19 = vmul.f32 %v646_v8, %v640_v4  ;;  %v667_v20 = vmul.f32 %v664_v9, %v658_v5  ;;  %v650_v21 = vmul.f32 %v646_v8, %v641_v6  ;;  %v668_v22 = vmul.f32 %v664_v9, %v659_v7  ;;  %v778_v43 = vld [vmem:[#allocation14 + $0x100] sm:$0xff]  ;;  %v779_v44 = vld [vmem:[#allocation14 + $0x108] sm:$0xff]  ;;  %v796_v50 = vld [vmem:[#allocation14 + $0x190] sm:$0xff]  ;;  %2296 = vmatprep.subr.bf16.mxu0 %v2295_v55 }
 0x109   : > { %v3492_v26 = vadd.f32 %v665_v13, %v647_v12  ;;  %v3494_v27 = vadd.f32 %v666_v15, %v648_v14  ;;  %v651_v28 = vmul.f32 %v646_v8, %v642_v10  ;;  %v669_v29 = vmul.f32 %v664_v9, %v660_v11  ;;  %v797_v51 = vld [vmem:[#allocation14 + $0x198] sm:$0xff]  ;;  %v748_v1 = vld [vmem:[#allocation14 + $0x10] sm:$0xff]  ;;  %v766_v6 = vld [vmem:[#allocation14 + $0xa0] sm:$0xff]  ;;  %p4291_p0 = scmp.ne.s32.totalorder %s4289_s23, 0 }
 0x10a   : > { %v3496_v33 = vadd.f32 %v667_v20, %v649_v19  ;;  %v3498_v34 = vadd.f32 %v668_v22, %v650_v21  ;;  %v652_v35 = vmul.f32 %v646_v8, %v643_v16  ;;  %v670_v36 = vmul.f32 %v664_v9, %v661_v17  ;;  %v749_v2 = vld [vmem:[#allocation14 + $0x18] sm:$0xff]  ;;  %v780_v4 = vld [vmem:[#allocation14 + $0x110] sm:$0xff]  ;;  %v767_v7 = vld [vmem:[#allocation14 + $0xa8] sm:$0xff] }
 0x10b   : > { %v689_v40 = vmul.f32 %v3492_v26, %v3492_v26  ;;  %681 = vst [vmem:[%s3503_s28] sm:$0xff] %v3492_v26  ;;  %682 = vst [vmem:[%s3503_s28 + $0x8] sm:$0xff] %v3494_v27  ;;  %v3509_v41 = vadd.f32 %v669_v29, %v651_v28  ;;  %v653_v42 = vmul.f32 %v646_v8, %v644_v18  ;;  %v781_v5 = vld [vmem:[#allocation14 + $0x118] sm:$0xff]  ;;  %v799_v10 = vld [vmem:[#allocation14 + $0x1a8] sm:$0xff]  ;;  %s3966_s17 = scalar_lea.hbm %s4290_s6, %s2144_s12  ;;  %p2814_p7 = pnand %p2813_p2, %p4291_p0 }
 0x10c   : > { %v691_v46 = vmul.f32 %v3496_v33, %v3496_v33  ;;  %683 = vst [vmem:[%s3503_s28 + $0x10] sm:$0xff] %v3496_v33  ;;  %684 = vst [vmem:[%s3503_s28 + $0x18] sm:$0xff] %v3498_v34  ;;  %v3517_v47 = vadd.f32 %v670_v36, %v652_v35  ;;  %v671_v48 = vmul.f32 %v664_v9, %v662_v23  ;;  %v750_v16 = vld [vmem:[#allocation14 + $0x20] sm:$0xff]  ;;  %v751_v17 = vld [vmem:[#allocation14 + $0x28] sm:$0xff] }
 0x10d   : > { %697 = vadd.xlane.f32.xlu0 %v689_v40  ;;  %v690_v52 = vmul.f32 %v3494_v27, %v3494_v27  ;;  %685 = vst [vmem:[%s3503_s28 + $0x20] sm:$0xff] %v3509_v41  ;;  %v654_v53 = vmul.f32 %v646_v8, %v645_v24  ;;  %v672_v54 = vmul.f32 %v664_v9, %v663_v25  ;;  %v798_v9 = vld [vmem:[#allocation14 + $0x1a0] sm:$0xff]  ;;  %v783_v19 = vld [vmem:[#allocation14 + $0x128] sm:$0xff]  ;;  %v768_v20 = vld [vmem:[#allocation14 + $0xb0] sm:$0xff]  ;;  %p2815_p9 = pneg %p2814_p7 }
 0x10e   : > { %701 = vadd.xlane.f32.xlu1 %v691_v46  ;;  %v692_v56 = vmul.f32 %v3498_v34, %v3498_v34  ;;  %686 = vst [vmem:[%s3503_s28 + $0x28] sm:$0xff] %v3517_v47  ;;  %v3527_v57 = vadd.f32 %v671_v48, %v653_v42  ;;  %v2327_v58 = vpack.c.bf16 %v795_v37, %v794_v32  ;;  %v782_v18 = vld [vmem:[#allocation14 + $0x120] sm:$0xff]  ;;  %v769_v21 = vld [vmem:[#allocation14 + $0xb8] sm:$0xff]  ;;  %v800_v22 = vld [vmem:[#allocation14 + $0x1b0] sm:$0xff] }
 0x10f   : > { %v2297_v59 = vpack.c.bf16 %v747_v39, %v746_v38  ;;  %v3529_v60 = vadd.f32 %v672_v54, %v654_v53  ;;  %v2329_v61 = vpack.c.bf16 %v779_v44, %v778_v43  ;;  %v2299_v62 = vpack.c.bf16 %v765_v49, %v764_v45  ;;  %v801_v23 = vld [vmem:[#allocation14 + $0x1b8] sm:$0xff]  ;;  %v752_v30 = vld [vmem:[#allocation14 + $0x30] sm:$0xff]  ;;  %v770_v36 = vld [vmem:[#allocation14 + $0xc0] sm:$0xff] }
 0x110   : > { %v2331_v63 = vpack.c.bf16 %v797_v51, %v796_v50  ;;  %687 = vst [vmem:[%s3503_s28 + $0x30] sm:$0xff] %v3527_v57  ;;  %2328 = vmatprep.subr.bf16.mxu1 %v2327_v58  ;;  %v693_v0 = vmul.f32 %v3509_v41, %v3509_v41  ;;  %v694_v3 = vmul.f32 %v3517_v47, %v3517_v47  ;;  %v753_v31 = vld [vmem:[#allocation14 + $0x38] sm:$0xff]  ;;  %v784_v32 = vld [vmem:[#allocation14 + $0x130] sm:$0xff]  ;;  %v771_v37 = vld [vmem:[#allocation14 + $0xc8] sm:$0xff] }
 0x111   : > { %2298 = vmatpush3.bf16.xpose.msra.mxu0 %v2297_v59  ;;  %699 = vadd.xlane.f32.xlu0 %v690_v52  ;;  %688 = vst [vmem:[%s3503_s28 + $0x38] sm:$0xff] %v3529_v60  ;;  %v2301_v8 = vpack.c.bf16 %v749_v2, %v748_v1  ;;  %v695_v11 = vmul.f32 %v3527_v57, %v3527_v57  ;;  %v785_v35 = vld [vmem:[#allocation14 + $0x138] sm:$0xff]  ;;  %v802_v38 = vld [vmem:[#allocation14 + $0x1c0] sm:$0xff]  ;;  %v803_v39 = vld [vmem:[#allocation14 + $0x1c8] sm:$0xff] }
 0x112   : > { %2330 = vmatpush3.bf16.xpose.msra.mxu1 %v2329_v61  ;;  %703 = vadd.xlane.f32.xlu1 %v692_v56  ;;  %v2333_v12 = vpack.c.bf16 %v781_v5, %v780_v4  ;;  %v696_v13 = vmul.f32 %v3529_v60, %v3529_v60  ;;  %v2303_v14 = vpack.c.bf16 %v767_v7, %v766_v6  ;;  %v754_v45 = vld [vmem:[#allocation14 + $0x40] sm:$0xff]  ;;  %v755_v46 = vld [vmem:[#allocation14 + $0x48] sm:$0xff]  ;;  %v772_v50 = vld [vmem:[#allocation14 + $0xd0] sm:$0xff] }
 0x113   : > { %2300 = vmatprep.subr.bf16.mxu0 %v2299_v62  ;;  %2332 = vmatprep.subr.bf16.mxu1 %v2331_v63  ;;  %v2335_v15 = vpack.c.bf16 %v799_v10, %v798_v9  ;;  %v2305_v24 = vpack.c.bf16 %v751_v17, %v750_v16  ;;  %v2337_v25 = vpack.c.bf16 %v783_v19, %v782_v18  ;;  %v786_v48 = vld [vmem:[#allocation14 + $0x140] sm:$0xff]  ;;  %v787_v49 = vld [vmem:[#allocation14 + $0x148] sm:$0xff]  ;;  %v773_v51 = vld [vmem:[#allocation14 + $0xd8] sm:$0xff] }
 0x114   : > { %v2307_v28 = vpack.c.bf16 %v769_v21, %v768_v20  ;;  %v2339_v29 = vpack.c.bf16 %v801_v23, %v800_v22  ;;  %v2309_v40 = vpack.c.bf16 %v753_v31, %v752_v30  ;;  %v2341_v42 = vpack.c.bf16 %v785_v35, %v784_v32  ;;  %v804_v52 = vld [vmem:[#allocation14 + $0x1d0] sm:$0xff]  ;;  %v805_v53 = vld [vmem:[#allocation14 + $0x1d8] sm:$0xff]  ;;  %v775_v1 = vld [vmem:[#allocation14 + $0xe8] sm:$0xff] }
 0x115   : > { %705 = vadd.xlane.f32.xlu0 %v693_v0  ;;  %v2311_v43 = vpack.c.bf16 %v771_v37, %v770_v36  ;;  %v2343_v44 = vpack.c.bf16 %v803_v39, %v802_v38  ;;  %v2313_v54 = vpack.c.bf16 %v755_v46, %v754_v45  ;;  %v2345_v55 = vpack.c.bf16 %v787_v49, %v786_v48  ;;  %v756_v59 = vld [vmem:[#allocation14 + $0x50] sm:$0xff]  ;;  %v757_v61 = vld [vmem:[#allocation14 + $0x58] sm:$0xff]  ;;  %v774_v0 = vld [vmem:[#allocation14 + $0xe0] sm:$0xff] }
 0x116   : > { %707 = vadd.xlane.f32.xlu1 %v694_v3  ;;  %v2315_v56 = vpack.c.bf16 %v773_v51, %v772_v50  ;;  %v2347_v58 = vpack.c.bf16 %v805_v53, %v804_v52  ;;  %v788_v62 = vld [vmem:[#allocation14 + $0x150] sm:$0xff]  ;;  %v789_v63 = vld [vmem:[#allocation14 + $0x158] sm:$0xff]  ;;  %v806_v2 = vld [vmem:[#allocation14 + $0x1e0] sm:$0xff]  ;;  %v2317_v4 = vpack.c.bf16 %v757_v61, %v756_v59  ;;  %v2319_v6 = vpack.c.bf16 %v775_v1, %v774_v0 }
 0x117   : > { %v807_v3 = vld [vmem:[#allocation14 + $0x1e8] sm:$0xff]  ;;  %v2349_v5 = vpack.c.bf16 %v789_v63, %v788_v62  ;;  %v790_v10 = vld [vmem:[#allocation14 + $0x160] sm:$0xff]  ;;  %v760_v20 = vld [vmem:[#allocation14 + $0x70] sm:$0xff] }
 0x118   : > { %v2351_v7 = vpack.c.bf16 %v807_v3, %v806_v2  ;;  %v759_v9 = vld [vmem:[#allocation14 + $0x68] sm:$0xff]  ;;  %v761_v21 = vld [vmem:[#allocation14 + $0x78] sm:$0xff]  ;;  %v792_v22 = vld [vmem:[#allocation14 + $0x170] sm:$0xff] }
 0x119   : > { %2302 = vmatpush3.bf16.xpose.msra.mxu0 %v2301_v8  ;;  %709 = vadd.xlane.f32.xlu0 %v695_v11  ;;  %v758_v8 = vld [vmem:[#allocation14 + $0x60] sm:$0xff]  ;;  %v791_v11 = vld [vmem:[#allocation14 + $0x168] sm:$0xff]  ;;  %v793_v23 = vld [vmem:[#allocation14 + $0x178] sm:$0xff] }
 0x11a   : > { %2334 = vmatpush3.bf16.xpose.msra.mxu1 %v2333_v12  ;;  %711 = vadd.xlane.f32.xlu1 %v696_v13  ;;  %v776_v12 = vld [vmem:[#allocation14 + $0xf0] sm:$0xff]  ;;  %v777_v13 = vld [vmem:[#allocation14 + $0xf8] sm:$0xff]  ;;  %v2321_v16 = vpack.c.bf16 %v759_v9, %v758_v8  ;;  %v2353_v17 = vpack.c.bf16 %v791_v11, %v790_v10  ;;  %v810_v53 = vld [vmem:[#allocation14 + $0x200] sm:$0xff] }
 0x11b   : > { %2304 = vmatprep.subr.bf16.mxu0 %v2303_v14  ;;  %2336 = vmatprep.subr.bf16.mxu1 %v2335_v15  ;;  %v808_v14 = vld [vmem:[#allocation14 + $0x1f0] sm:$0xff]  ;;  %v809_v15 = vld [vmem:[#allocation14 + $0x1f8] sm:$0xff]  ;;  %v2323_v18 = vpack.c.bf16 %v777_v13, %v776_v12  ;;  %v830_v10 = vld [vmem:[#allocation14 + $0x2a0] sm:$0xff] }
 0x11c   : > { %v2355_v19 = vpack.c.bf16 %v809_v15, %v808_v14  ;;  %v813_v8 = vld [vmem:[#allocation14 + $0x218] sm:$0xff]  ;;  %v831_v11 = vld [vmem:[#allocation14 + $0x2a8] sm:$0xff] }
 0x11d   : > { %v2367_v14 = vpack.c.bf16 %v831_v11, %v830_v10 }
 0x121   : > { %2306 = vmatpush3.bf16.xpose.msra.mxu0 %v2305_v24  ;;  %v826_v24 = vld [vmem:[#allocation14 + $0x280] sm:$0xff] }
 0x122   : > { %2338 = vmatpush3.bf16.xpose.msra.mxu1 %v2337_v25  ;;  %2308 = vmatprep.subr.bf16.mxu0 %v2307_v28  ;;  %v827_v25 = vld [vmem:[#allocation14 + $0x288] sm:$0xff]  ;;  %v2325_v28 = vpack.c.bf16 %v761_v21, %v760_v20 }
 0x123   : > { %2340 = vmatprep.subr.bf16.mxu1 %v2339_v29  ;;  %v2357_v29 = vpack.c.bf16 %v793_v23, %v792_v22  ;;  %v2359_v30 = vpack.c.bf16 %v827_v25, %v826_v24  ;;  %v816_v24 = vld [vmem:[#allocation14 + $0x230] sm:$0xff]  ;;  %v817_v25 = vld [vmem:[#allocation14 + $0x238] sm:$0xff] }
 0x129   : > { %2310 = vmatpush3.bf16.xpose.msra.mxu0 %v2309_v40 }
 0x12a   : > { %2342 = vmatpush3.bf16.xpose.msra.mxu1 %v2341_v42  ;;  %2312 = vmatprep.subr.bf16.mxu0 %v2311_v43 }
 0x12b   : > { %2344 = vmatprep.subr.bf16.mxu1 %v2343_v44 }
 0x131   : > { %2314 = vmatpush3.bf16.xpose.msra.mxu0 %v2313_v54  ;;  %v811_v54 = vld [vmem:[#allocation14 + $0x208] sm:$0xff] }
 0x132   : > { %2346 = vmatpush3.bf16.xpose.msra.mxu1 %v2345_v55  ;;  %2316 = vmatprep.subr.bf16.mxu0 %v2315_v56  ;;  %v828_v55 = vld [vmem:[#allocation14 + $0x290] sm:$0xff]  ;;  %v829_v56 = vld [vmem:[#allocation14 + $0x298] sm:$0xff]  ;;  %v2361_v62 = vpack.c.bf16 %v811_v54, %v810_v53 }
 0x133   : > { %2348 = vmatprep.subr.bf16.mxu1 %v2347_v58  ;;  %v2363_v1 = vpack.c.bf16 %v829_v56, %v828_v55  ;;  %v824_v53 = vld [vmem:[#allocation14 + $0x270] sm:$0xff]  ;;  %v825_v54 = vld [vmem:[#allocation14 + $0x278] sm:$0xff] }
 0x134   : > { %v2389_v55 = vpack.c.bf16 %v825_v54, %v824_v53 }
 0x139   : > { %2318 = vmatpush3.bf16.xpose.msra.mxu0 %v2317_v4 }
 0x13a   : > { %2350 = vmatpush3.bf16.xpose.msra.mxu1 %v2349_v5  ;;  %2320 = vmatprep.subr.bf16.mxu0 %v2319_v6 }
 0x13b   : > { %2352 = vmatprep.subr.bf16.mxu1 %v2351_v7  ;;  %v812_v7 = vld [vmem:[#allocation14 + $0x210] sm:$0xff] }
 0x141   : > { %2322 = vmatpush3.bf16.xpose.msra.mxu0 %v2321_v16  ;;  %v814_v16 = vld [vmem:[#allocation14 + $0x220] sm:$0xff] }
 0x142   : > { %2354 = vmatpush3.bf16.xpose.msra.mxu1 %v2353_v17  ;;  %2324 = vmatprep.subr.bf16.mxu0 %v2323_v18  ;;  %v815_v17 = vld [vmem:[#allocation14 + $0x228] sm:$0xff] }
 0x143   : > { %2356 = vmatprep.subr.bf16.mxu1 %v2355_v19  ;;  %v833_v19 = vld [vmem:[#allocation14 + $0x2b8] sm:$0xff] }
 0x149   : > { %2326 = vmatpush3.bf16.xpose.msra.mxu0 %v2325_v28 }
 0x14a   : > { %2358 = vmatpush3.bf16.xpose.msra.mxu1 %v2357_v29  ;;  %2360 = vmatprep.subr.bf16.mxu0 %v2359_v30  ;;  %v835_v29 = vld [vmem:[#allocation14 + $0x2c8] sm:$0xff] }
 0x14b   : > { %2391 = vmatprep.subr.bf16.mxu1 %v2359_v30 }
 0x19a   : > { %v698_v31 = vpop.xlane.xlu0 %697 }
 0x19b   : > { %v714_v32 = vmul.f32 0.0078125, %v698_v31  ;;  %v702_v35 = vpop.xlane.xlu1 %701 }
 0x19c   : > { %v716_v36 = vmul.f32 0.0078125, %v702_v35  ;;  %v819_v35 = vld [vmem:[#allocation14 + $0x248] sm:$0xff] }
 0x19d   : > { %v722_v37 = vadd.f32 1.1920929e-07, %v714_v32  ;;  %v818_v32 = vld [vmem:[#allocation14 + $0x240] sm:$0xff] }
 0x19e   : > { %v700_v38 = vpop.xlane.xlu0 %699  ;;  %v724_v39 = vadd.f32 1.1920929e-07, %v716_v36  ;;  %v836_v36 = vld [vmem:[#allocation14 + $0x2d0] sm:$0xff] }
 0x19f   : > { %2528 = vrsqrt.f32 %v722_v37  ;;  %v715_v40 = vmul.f32 0.0078125, %v700_v38  ;;  %v704_v42 = vpop.xlane.xlu1 %703  ;;  %v837_v37 = vld [vmem:[#allocation14 + $0x2d8] sm:$0xff] }
 0x1a0   : > { %v717_v43 = vmul.f32 0.0078125, %v704_v42  ;;  %2530 = vrsqrt.f32 %v724_v39  ;;  %v2379_v38 = vpack.c.bf16 %v837_v37, %v836_v36  ;;  %v820_v39 = vld [vmem:[#allocation14 + $0x250] sm:$0xff]  ;;  %v838_v42 = vld [vmem:[#allocation14 + $0x2e0] sm:$0xff] }
 0x1a1   : > { %v723_v44 = vadd.f32 1.1920929e-07, %v715_v40  ;;  %v821_v40 = vld [vmem:[#allocation14 + $0x258] sm:$0xff] }
 0x1a2   : > { %v725_v45 = vadd.f32 1.1920929e-07, %v717_v43  ;;  %v706_v46 = vpop.xlane.xlu0 %705  ;;  %v839_v43 = vld [vmem:[#allocation14 + $0x2e8] sm:$0xff] }
 0x1a3   : > { %2532 = vrsqrt.f32 %v723_v44  ;;  %v718_v48 = vmul.f32 0.0078125, %v706_v46  ;;  %v708_v49 = vpop.xlane.xlu1 %707  ;;  %v2381_v44 = vpack.c.bf16 %v821_v40, %v820_v39  ;;  %v822_v46 = vld [vmem:[#allocation14 + $0x260] sm:$0xff] }
 0x1a4   : > { %2534 = vrsqrt.f32 %v725_v45  ;;  %v719_v51 = vmul.f32 0.0078125, %v708_v49  ;;  %v2383_v45 = vpack.c.bf16 %v839_v43, %v838_v42  ;;  %v840_v49 = vld [vmem:[#allocation14 + $0x2f0] sm:$0xff] }
 0x1a5   : > { %v726_v50 = vadd.f32 1.1920929e-07, %v718_v48  ;;  %v823_v48 = vld [vmem:[#allocation14 + $0x268] sm:$0xff] }
 0x1a6   : > { %v710_v52 = vpop.xlane.xlu0 %709  ;;  %v727_v63 = vadd.f32 1.1920929e-07, %v719_v51  ;;  %v2385_v51 = vpack.c.bf16 %v823_v48, %v822_v46 }
 0x1a7   : > { %2536 = vrsqrt.f32 %v726_v50  ;;  %v720_v59 = vmul.f32 0.0078125, %v710_v52  ;;  %v712_v2 = vpop.xlane.xlu1 %711  ;;  %v841_v50 = vld [vmem:[#allocation14 + $0x2f8] sm:$0xff] }
 0x1a8   : > { %2538 = vrsqrt.f32 %v727_v63  ;;  %v721_v6 = vmul.f32 0.0078125, %v712_v2  ;;  %v2387_v52 = vpack.c.bf16 %v841_v50, %v840_v49 }
 0x1a9   : > { %v2529_v58 = vpop.eup %2528  ;;  %v728_v4 = vadd.f32 1.1920929e-07, %v720_v59 }
 0x1aa   : > { %v3544_v61 = vmul.f32 %v2529_v58, %v3492_v26  ;;  %v2531_v0 = vpop.eup %2530 }
 0x1ab   : > { %v3554_v26 = vmul.f32 %v2531_v0, %v3496_v33  ;;  %2540 = vrsqrt.f32 %v728_v4  ;;  %v729_v33 = vadd.f32 1.1920929e-07, %v721_v6 }
 0x1ac   : > { %2183 = vmatprep.mubr.f32.mxu0 %v3544_v61  ;;  %2231 = vmatprep.mubr.f32.mxu1 %v3544_v61 }
 0x1ad   : > { %v2533_v3 = vpop.eup %2532  ;;  %2184 = vmatmul.mubr.f32.vlgmr.msra.gmra.mrb[0].mxu0 %v3544_v61  ;;  %2232 = vmatmul.mubr.f32.vlgmr.msra.gmra.mrb[0].mxu1 %v3544_v61  ;;  %2542 = vrsqrt.f32 %v729_v33 }
 0x1ae   : > { %v3551_v5 = vmul.f32 %v2533_v3, %v3494_v27  ;;  %2362 = vmatpush3.bf16.xpose.msra.mxu0 %v2361_v62  ;;  %2399 = vmatpush3.bf16.xpose.msra.mxu1 %v2361_v62  ;;  %v2535_v9 = vpop.eup %2534  ;;  %v2365_v27 = vpack.c.bf16 %v813_v8, %v812_v7 }
 0x1af   : > { %2364 = vmatprep.subr.bf16.mxu0 %v2363_v1  ;;  %2392 = vmatprep.subr.bf16.mxu1 %v2363_v1  ;;  %v3563_v13 = vmul.f32 %v2535_v9, %v3498_v34  ;;  %v832_v34 = vld [vmem:[#allocation14 + $0x2b0] sm:$0xff] }
 0x1b0   : > { %2185 = vmatprep.mubr.f32.mxu0 %v3551_v5  ;;  %2233 = vmatprep.mubr.f32.mxu1 %v3551_v5  ;;  %v2371_v22 = vpack.c.bf16 %v833_v19, %v832_v34 }
 0x1b1   : > { %2186 = vmatmul.mubr.f32.gmra.mrb[2].mxu0 %v3551_v5  ;;  %2234 = vmatmul.mubr.f32.gmra.mrb[2].mxu1 %v3551_v5  ;;  %v2537_v12 = vpop.eup %2536 }
 0x1b2   : > { %2187 = vmatprep.mubr.f32.mxu0 %v3554_v26  ;;  %2235 = vmatprep.mubr.f32.mxu1 %v3554_v26  ;;  %v3568_v15 = vmul.f32 %v2537_v12, %v3509_v41  ;;  %v2539_v18 = vpop.eup %2538  ;;  %v2369_v41 = vpack.c.bf16 %v815_v17, %v814_v16 }
 0x1b3   : > { %v3577_v21 = vmul.f32 %v2539_v18, %v3517_v47  ;;  %v834_v47 = vld [vmem:[#allocation14 + $0x2c0] sm:$0xff] }
 0x1b4   : > { %v2375_v31 = vpack.c.bf16 %v835_v29, %v834_v47 }
 0x1b5   : > { %2188 = vmatmul.mubr.f32.gmra.mrb[4].mxu0 %v3554_v26  ;;  %2236 = vmatmul.mubr.f32.gmra.mrb[4].mxu1 %v3554_v26  ;;  %v2541_v20 = vpop.eup %2540 }
 0x1b6   : > { %2366 = vmatpush3.bf16.xpose.msra.mxu0 %v2365_v27  ;;  %2400 = vmatpush3.bf16.xpose.msra.mxu1 %v2365_v27  ;;  %v3582_v23 = vmul.f32 %v2541_v20, %v3527_v57  ;;  %v2373_v57 = vpack.c.bf16 %v817_v25, %v816_v24 }
 0x1b7   : > { %2189 = vmatprep.mubr.f32.mxu0 %v3563_v13  ;;  %2368 = vmatprep.subr.bf16.mxu0 %v2367_v14  ;;  %v2543_v28 = vpop.eup %2542 }
 0x1b8   : > { %2393 = vmatprep.subr.bf16.mxu1 %v2367_v14  ;;  %2237 = vmatprep.mubr.f32.mxu1 %v3563_v13  ;;  %v745_v30 = vmul.f32 %v2543_v28, %v3529_v60  ;;  %v2377_v60 = vpack.c.bf16 %v819_v35, %v818_v32 }
 0x1b9   : > { %2190 = vmatmul.mubr.f32.gmra.mrb[6].mxu0 %v3563_v13  ;;  %2238 = vmatmul.mubr.f32.gmra.mrb[6].mxu1 %v3563_v13 }
 0x1ba   : > { %2191 = vmatprep.mubr.f32.mxu0 %v3568_v15  ;;  %2239 = vmatprep.mubr.f32.mxu1 %v3568_v15 }
 0x1bd   : > { %2192 = vmatmul.mubr.f32.gmra.mrb[8].mxu0 %v3568_v15  ;;  %2240 = vmatmul.mubr.f32.gmra.mrb[8].mxu1 %v3568_v15 }
 0x1be   : > { %2370 = vmatpush3.bf16.xpose.msra.mxu0 %v2369_v41  ;;  %2401 = vmatpush3.bf16.xpose.msra.mxu1 %v2369_v41 }
 0x1bf   : > { %2193 = vmatprep.mubr.f32.mxu0 %v3577_v21  ;;  %2372 = vmatprep.subr.bf16.mxu0 %v2371_v22 }
 0x1c0   : > { %2394 = vmatprep.subr.bf16.mxu1 %v2371_v22  ;;  %2241 = vmatprep.mubr.f32.mxu1 %v3577_v21 }
 0x1c1   : > { %2194 = vmatmul.mubr.f32.gmra.mrb[10].mxu0 %v3577_v21  ;;  %2242 = vmatmul.mubr.f32.gmra.mrb[10].mxu1 %v3577_v21 }
 0x1c2   : > { %2195 = vmatprep.mubr.f32.mxu0 %v3582_v23  ;;  %2243 = vmatprep.mubr.f32.mxu1 %v3582_v23 }
 0x1c5   : > { %2196 = vmatmul.mubr.f32.gmra.mrb[12].mxu0 %v3582_v23  ;;  %2244 = vmatmul.mubr.f32.gmra.mrb[12].mxu1 %v3582_v23 }
 0x1c6   : > { %2374 = vmatpush3.bf16.xpose.msra.mxu0 %v2373_v57  ;;  %2402 = vmatpush3.bf16.xpose.msra.mxu1 %v2373_v57 }
 0x1c7   : > { %2197 = vmatprep.mubr.f32.mxu0 %v745_v30  ;;  %2376 = vmatprep.subr.bf16.mxu0 %v2375_v31 }
 0x1c8   : > { %2395 = vmatprep.subr.bf16.mxu1 %v2375_v31  ;;  %2245 = vmatprep.mubr.f32.mxu1 %v745_v30 }
 0x1c9   : > { %2198 = vmatmul.mubr.f32.gmra.mrb[14].mxu0 %v745_v30  ;;  %2246 = vmatmul.mubr.f32.gmra.mrb[14].mxu1 %v745_v30 }
 0x1ca   : > { %2279 = vmatprep.mubr.f32.mxu0 %v3544_v61  ;;  %2287 = vmatprep.mubr.f32.mxu1 %v3568_v15 }
 0x1ce   : > { %2378 = vmatpush3.bf16.xpose.msra.mxu0 %v2377_v60  ;;  %2403 = vmatpush3.bf16.xpose.msra.mxu1 %v2377_v60 }
 0x1cf   : > { %2380 = vmatprep.subr.bf16.mxu0 %v2379_v38  ;;  %2396 = vmatprep.subr.bf16.mxu1 %v2379_v38 }
 0x1d6   : > { %2382 = vmatpush3.bf16.xpose.msra.mxu0 %v2381_v44  ;;  %2404 = vmatpush3.bf16.xpose.msra.mxu1 %v2381_v44 }
 0x1d7   : > { %2384 = vmatprep.subr.bf16.mxu0 %v2383_v45  ;;  %2397 = vmatprep.subr.bf16.mxu1 %v2383_v45 }
 0x1de   : > { %2386 = vmatpush3.bf16.xpose.msra.mxu0 %v2385_v51  ;;  %2405 = vmatpush3.bf16.xpose.msra.mxu1 %v2385_v51 }
 0x1df   : > { %2388 = vmatprep.subr.bf16.mxu0 %v2387_v52  ;;  %2398 = vmatprep.subr.bf16.mxu1 %v2387_v52 }
 0x1e6   : > { %2390 = vmatpush3.bf16.xpose.msra.mxu0 %v2389_v55  ;;  %2406 = vmatpush3.bf16.xpose.msra.mxu1 %v2389_v55  ;;  %v1412_v55 = vld [vmem:[%s3470_s11 + $0x40] sm:$0xff] }
 0x1ed   : > { %2280 = vmatmul.mubr.f32.vlgmr.msra.gmra.mrb[16].mxu0 %v3544_v61  ;;  %2288 = vmatmul.mubr.f32.vlgmr.msra.gmra.mrb[16].mxu1 %v3568_v15 }
 0x1ee   : > { %2281 = vmatprep.mubr.f32.mxu0 %v3551_v5  ;;  %2289 = vmatprep.mubr.f32.mxu1 %v3577_v21 }
 0x1f1   : > { %2282 = vmatmul.mubr.f32.gmra.mrb[18].mxu0 %v3551_v5  ;;  %2290 = vmatmul.mubr.f32.gmra.mrb[18].mxu1 %v3577_v21 }
 0x1f2   : > { %2283 = vmatprep.mubr.f32.mxu0 %v3554_v26  ;;  %2291 = vmatprep.mubr.f32.mxu1 %v3582_v23 }
 0x1f5   : > { %2284 = vmatmul.mubr.f32.gmra.mrb[20].mxu0 %v3554_v26  ;;  %2292 = vmatmul.mubr.f32.gmra.mrb[20].mxu1 %v3582_v23 }
 0x1f6   : > { %2285 = vmatprep.mubr.f32.mxu0 %v3563_v13  ;;  %2293 = vmatprep.mubr.f32.mxu1 %v745_v30 }
 0x1f9   : > { %2286 = vmatmul.mubr.f32.gmra.mrb[22].mxu0 %v3563_v13  ;;  %2294 = vmatmul.mubr.f32.gmra.mrb[22].mxu1 %v745_v30 }
 0x280   : > { %v3607_v56 = vpop.f32.mrb[0].mxu0  ;;  %v3609_v58 = vpop.f32.mrb[0].mxu1 }
 0x281   : > { %v3611_v59 = vpop.f32.mrb[1].mxu0  ;;  %v3613_v61 = vpop.f32.mrb[1].mxu1  ;;  %v1197_v62 = vmul.f32 %v3607_v56, %v3607_v56  ;;  %v1301_v4 = vmul.f32 %v3609_v58, %v3609_v58 }
 0x282   : > { %v1457_v63 = vmul.f32 %v3611_v59, %v3611_v59  ;;  %v1561_v7 = vmul.f32 %v3613_v61, %v3613_v61 }
 0x283   : > { %1205 = vadd.xlane.f32.xlu0 %v1197_v62  ;;  %v3734_v62 = vstv %s2119_s8 }
 0x284   : > { %1465 = vadd.xlane.f32.xlu1 %v1457_v63  ;;  %v3619_v0 = vpop.f32.mrb[2].mxu0  ;;  %v3621_v1 = vpop.f32.mrb[2].mxu1  ;;  %v1408_v63 = vld [vmem:[%s3470_s11] sm:$0xff] }
 0x285   : > { %v3623_v2 = vpop.f32.mrb[3].mxu0  ;;  %v3625_v3 = vpop.f32.mrb[3].mxu1  ;;  %v1198_v5 = vmul.f32 %v3619_v0, %v3619_v0  ;;  %v1302_v10 = vmul.f32 %v3621_v1, %v3621_v1 }
 0x286   : > { %v1458_v33 = vmul.f32 %v3623_v2, %v3623_v2  ;;  %v1562_v14 = vmul.f32 %v3625_v3, %v3625_v3 }
 0x287   : > { %1309 = vadd.xlane.f32.xlu0 %v1301_v4  ;;  %v1668_v4 = vld [vmem:[%s3470_s11 + $0x8] sm:$0xff] }
 0x288   : > { %1207 = vadd.xlane.f32.xlu1 %v1198_v5  ;;  %v3631_v26 = vpop.f32.mrb[4].mxu0  ;;  %v3633_v6 = vpop.f32.mrb[4].mxu1  ;;  %v1672_v5 = vld [vmem:[%s3470_s11 + $0x48] sm:$0xff] }
 0x289   : > { %v3637_v8 = vpop.f32.mrb[5].mxu0  ;;  %v3639_v9 = vpop.f32.mrb[5].mxu1  ;;  %v1199_v15 = vmul.f32 %v3631_v26, %v3631_v26  ;;  %v1303_v41 = vmul.f32 %v3633_v6, %v3633_v6 }
 0x28a   : > { %v1459_v29 = vmul.f32 %v3637_v8, %v3637_v8  ;;  %v1563_v36 = vmul.f32 %v3639_v9, %v3639_v9 }
 0x28b   : > { %1569 = vadd.xlane.f32.xlu0 %v1561_v7  ;;  %v3739_v7 = vstv %s1397_s29 }
 0x28c   : > { %1311 = vadd.xlane.f32.xlu1 %v1302_v10  ;;  %v3643_v11 = vpop.f32.mrb[6].mxu0  ;;  %v3645_v27 = vpop.f32.mrb[6].mxu1  ;;  %v1421_v10 = vmul.f32 %v3734_v62, %v1412_v55 }
 0x28d   : > { %v3649_v12 = vpop.f32.mrb[7].mxu1  ;;  %v3651_v13 = vpop.f32.mrb[7].mxu0  ;;  %v1200_v16 = vmul.f32 %v3643_v11, %v3643_v11  ;;  %v1304_v20 = vmul.f32 %v3645_v27, %v3645_v27 }
 0x28e   : > { %v1564_v25 = vmul.f32 %v3649_v12, %v3649_v12  ;;  %v1460_v39 = vmul.f32 %v3651_v13, %v3651_v13 }
 0x28f   : > { %1467 = vadd.xlane.f32.xlu0 %v1458_v33  ;;  %v1417_v33 = vmul.f32 %v3734_v62, %v1408_v63  ;;  %v1410_v63 = vld [vmem:[%s3470_s11 + $0x20] sm:$0xff] }
 0x290   : > { %1571 = vadd.xlane.f32.xlu1 %v1562_v14  ;;  %v3659_v17 = vpop.f32.mrb[8].mxu0  ;;  %v3661_v18 = vpop.f32.mrb[8].mxu1 }
 0x291   : > { %v3663_v34 = vpop.f32.mrb[9].mxu0  ;;  %v3665_v19 = vpop.f32.mrb[9].mxu1  ;;  %v1201_v40 = vmul.f32 %v3659_v17, %v3659_v17  ;;  %v1305_v43 = vmul.f32 %v3661_v18, %v3661_v18 }
 0x292   : > { %v1461_v31 = vmul.f32 %v3663_v34, %v3663_v34  ;;  %v1565_v46 = vmul.f32 %v3665_v19, %v3665_v19 }
 0x293   : > { %1209 = vadd.xlane.f32.xlu0 %v1199_v15 }
 0x294   : > { %1211 = vadd.xlane.f32.xlu1 %v1200_v16  ;;  %v3671_v21 = vpop.f32.mrb[10].mxu0  ;;  %v3673_v22 = vpop.f32.mrb[10].mxu1  ;;  %v1677_v16 = vmul.f32 %v1668_v4, %v3734_v62  ;;  %v1414_v4 = vld [vmem:[%s3470_s11 + $0x60] sm:$0xff] }
 0x295   : > { %v3675_v23 = vpop.f32.mrb[11].mxu1  ;;  %v3677_v24 = vpop.f32.mrb[11].mxu0  ;;  %v1202_v38 = vmul.f32 %v3671_v21, %v3671_v21  ;;  %v1306_v42 = vmul.f32 %v3673_v22, %v3673_v22 }
 0x296   : > { %v1566_v44 = vmul.f32 %v3675_v23, %v3675_v23  ;;  %v1462_v49 = vmul.f32 %v3677_v24, %v3677_v24 }
 0x297   : > { %1313 = vadd.xlane.f32.xlu0 %v1303_v41  ;;  %v1681_v41 = vmul.f32 %v1672_v5, %v3734_v62 }
 0x298   : > { %1315 = vadd.xlane.f32.xlu1 %v1304_v20  ;;  %v3681_v28 = vpop.f32.mrb[12].mxu0  ;;  %v3683_v47 = vpop.f32.mrb[12].mxu1  ;;  %v1413_v20 = vld [vmem:[%s3470_s11 + $0x50] sm:$0xff] }
 0x299   : > { %v3687_v57 = vpop.f32.mrb[13].mxu0  ;;  %v3689_v30 = vpop.f32.mrb[13].mxu1  ;;  %v1203_v50 = vmul.f32 %v3681_v28, %v3681_v28  ;;  %v1307_v52 = vmul.f32 %v3683_v47, %v3683_v47 }
 0x29a   : > { %v1463_v45 = vmul.f32 %v3687_v57, %v3687_v57 }
 0x29b   : > { %1469 = vadd.xlane.f32.xlu0 %v1459_v29 }
 0x29c   : > { %1575 = vadd.xlane.f32.xlu1 %v1564_v25  ;;  %v3693_v32 = vpop.f32.mrb[14].mxu0  ;;  %v3695_v35 = vpop.f32.mrb[14].mxu1  ;;  %v1409_v25 = vld [vmem:[%s3470_s11 + $0x10] sm:$0xff] }
 0x29d   : > { %v3699_v37 = vpop.f32.mrb[15].mxu1  ;;  %v3701_v60 = vpop.f32.mrb[15].mxu0  ;;  %v1204_v48 = vmul.f32 %v3693_v32, %v3693_v32  ;;  %v1308_v51 = vmul.f32 %v3695_v35, %v3695_v35 }
 0x29e   : > { %v1568_v53 = vmul.f32 %v3699_v37, %v3699_v37  ;;  %v1464_v54 = vmul.f32 %v3701_v60, %v3701_v60 }
 0x29f   : > { %1573 = vadd.xlane.f32.xlu0 %v1563_v36 }
 0x2a0   : > { %1473 = vadd.xlane.f32.xlu1 %v1461_v31 }
 0x2a3   : > { %1471 = vadd.xlane.f32.xlu0 %v1460_v39  ;;  %v1567_v39 = vmul.f32 %v3689_v30, %v3689_v30 }
 0x2a4   : > { %1215 = vadd.xlane.f32.xlu1 %v1202_v38 }
 0x2a7   : > { %1213 = vadd.xlane.f32.xlu0 %v1201_v40  ;;  %v1669_v40 = vld [vmem:[%s3470_s11 + $0x18] sm:$0xff] }
 0x2a8   : > { %1319 = vadd.xlane.f32.xlu1 %v1306_v42  ;;  %v1673_v42 = vld [vmem:[%s3470_s11 + $0x58] sm:$0xff] }
 0x2a9   : > { %v1682_v55 = vmul.f32 %v1673_v42, %v3734_v62 }
 0x2ab   : > { %1317 = vadd.xlane.f32.xlu0 %v1305_v43 }
 0x2ac   : > { %1579 = vadd.xlane.f32.xlu1 %v1566_v44 }
 0x2af   : > { %1577 = vadd.xlane.f32.xlu0 %v1565_v46 }
 0x2b0   : > { %1477 = vadd.xlane.f32.xlu1 %v1463_v45 }
 0x2b3   : > { %1475 = vadd.xlane.f32.xlu0 %v1462_v49  ;;  %v1418_v49 = vmul.f32 %v3734_v62, %v1409_v25 }
 0x2b4   : > { %1219 = vadd.xlane.f32.xlu1 %v1204_v48  ;;  %v1422_v48 = vmul.f32 %v3734_v62, %v1413_v20 }
 0x2b7   : > { %1217 = vadd.xlane.f32.xlu0 %v1203_v50 }
 0x2b8   : > { %1323 = vadd.xlane.f32.xlu1 %v1308_v51 }
 0x2bb   : > { %1321 = vadd.xlane.f32.xlu0 %v1307_v52 }
 0x2bc   : > { %1583 = vadd.xlane.f32.xlu1 %v1568_v53 }
 0x2bf   : > { %1479 = vadd.xlane.f32.xlu0 %v1464_v54  ;;  %v1678_v54 = vmul.f32 %v1669_v40, %v3734_v62 }
 0x2c0   : > { %v1158_v14 = vpop.f32.mrb[16].mxu1  ;;  %v1134_v15 = vpop.f32.mrb[16].mxu0 }
 0x2c1   : > { %v1403_v29 = vmul.f32 %v3739_v7, %v1158_v14  ;;  %v1399_v31 = vmul.f32 %v3739_v7, %v1134_v15  ;;  %v1136_v36 = vpop.f32.mrb[17].mxu0  ;;  %v1160_v38 = vpop.f32.mrb[17].mxu1  ;;  %v1670_v15 = vld [vmem:[%s3470_s11 + $0x28] sm:$0xff] }
 0x2c2   : > { %v1659_v43 = vmul.f32 %v3739_v7, %v1136_v36  ;;  %v1663_v44 = vmul.f32 %v3739_v7, %v1160_v38  ;;  %v1423_v36 = vmul.f32 %v3734_v62, %v1414_v4 }
 0x2c3   : > { %v1429_v45 = vadd.f32 %v1421_v10, %v1403_v29  ;;  %v1425_v46 = vadd.f32 %v1417_v33, %v1399_v31  ;;  %1581 = vadd.xlane.f32.xlu0 %v1567_v39  ;;  %v1419_v31 = vmul.f32 %v3734_v62, %v1410_v63 }
 0x2c4   : > { %v1685_v50 = vadd.f32 %v1677_v16, %v1659_v43  ;;  %v1689_v51 = vadd.f32 %v1681_v41, %v1663_v44  ;;  %v1164_v52 = vpop.f32.mrb[18].mxu1  ;;  %v1140_v53 = vpop.f32.mrb[18].mxu0  ;;  %v1674_v16 = vld [vmem:[%s3470_s11 + $0x68] sm:$0xff]  ;;  %v1679_v43 = vmul.f32 %v1670_v15, %v3734_v62 }
 0x2c5   : > { %1453 = vst [vmem:[%s3762_s3 + $0x40] sm:$0xff] %v1429_v45  ;;  %1449 = vst [vmem:[%s3762_s3] sm:$0xff] %v1425_v46  ;;  %v1404_v5 = vmul.f32 %v3739_v7, %v1164_v52  ;;  %v1400_v10 = vmul.f32 %v3739_v7, %v1140_v53  ;;  %v1142_v33 = vpop.f32.mrb[19].mxu0  ;;  %v1166_v14 = vpop.f32.mrb[19].mxu1  ;;  %v1683_v44 = vmul.f32 %v1674_v16, %v3734_v62  ;;  %v1411_v45 = vld [vmem:[%s3470_s11 + $0x30] sm:$0xff]  ;;  %v1671_v52 = vld [vmem:[%s3470_s11 + $0x38] sm:$0xff] }
 0x2c6   : > { %1709 = vst [vmem:[%s3762_s3 + $0x8] sm:$0xff] %v1685_v50  ;;  %1713 = vst [vmem:[%s3762_s3 + $0x48] sm:$0xff] %v1689_v51  ;;  %v1660_v41 = vmul.f32 %v3739_v7, %v1142_v33  ;;  %v1664_v20 = vmul.f32 %v3739_v7, %v1166_v14  ;;  %v1415_v46 = vld [vmem:[%s3470_s11 + $0x70] sm:$0xff]  ;;  %v1675_v53 = vld [vmem:[%s3470_s11 + $0x78] sm:$0xff]  ;;  %s3009_s11 = smov [#allocation17]  }
 0x2c7   : > { %v1430_v25 = vadd.f32 %v1422_v48, %v1404_v5  ;;  %v1426_v29 = vadd.f32 %v1418_v49, %v1400_v10  ;;  %v1420_v5 = vmul.f32 %v3734_v62, %v1411_v45  ;;  %v1424_v10 = vmul.f32 %v3734_v62, %v1415_v46  ;;  %s2816_s15 = sshll.u32 %s3009_s11, 4  ;;  %s2817_s15 = int_to_ptr.vmem [resolvable:$false] %s2816_s15 }
 0x2c8   : > { %v1686_v38 = vadd.f32 %v1678_v54, %v1660_v41  ;;  %v1690_v39 = vadd.f32 %v1682_v55, %v1664_v20  ;;  %v1146_v40 = vpop.f32.mrb[20].mxu0  ;;  %v1170_v42 = vpop.f32.mrb[20].mxu1  ;;  %v1680_v41 = vmul.f32 %v1671_v52, %v3734_v62  ;;  %v1684_v20 = vmul.f32 %v1675_v53, %v3734_v62  ;;  %s2818_s10 = scalar_lea.vmem %s2817_s15, 2048  ;;  %p2819_p1 = scmp.lt.s32.totalorder %s3971_s25, %s2817_s15 }
 0x2c9   : > { %1454 = vst [vmem:[%s3762_s3 + $0x50] sm:$0xff] %v1430_v25  ;;  %1450 = vst [vmem:[%s3762_s3 + $0x10] sm:$0xff] %v1426_v29  ;;  %v1401_v48 = vmul.f32 %v3739_v7, %v1146_v40  ;;  %v1405_v49 = vmul.f32 %v3739_v7, %v1170_v42  ;;  %v1148_v50 = vpop.f32.mrb[21].mxu0  ;;  %v1172_v51 = vpop.f32.mrb[21].mxu1  ;;  %p2820_p10 = scmp.lt.s32.totalorder %s2818_s10, %s2812_s21 }
 0x2ca   : > { %1710 = vst [vmem:[%s3762_s3 + $0x18] sm:$0xff] %v1686_v38  ;;  %1714 = vst [vmem:[%s3762_s3 + $0x58] sm:$0xff] %v1690_v39  ;;  %v1661_v54 = vmul.f32 %v3739_v7, %v1148_v50  ;;  %v1665_v55 = vmul.f32 %v3739_v7, %v1172_v51 }
 0x2cb   : > { %v1427_v63 = vadd.f32 %v1419_v31, %v1401_v48  ;;  %v1431_v4 = vadd.f32 %v1423_v36, %v1405_v49  ;;  %p2821_p12 = por %p2820_p10, %p2819_p1 }
 0x2cc   : > { %v1687_v33 = vadd.f32 %v1679_v43, %v1661_v54  ;;  %v1691_v14 = vadd.f32 %v1683_v44, %v1665_v55  ;;  %v1152_v15 = vpop.f32.mrb[22].mxu0  ;;  %v1176_v16 = vpop.f32.mrb[22].mxu1 }
 0x2cd   : > { %1451 = vst [vmem:[%s3762_s3 + $0x20] sm:$0xff] %v1427_v63  ;;  %1455 = vst [vmem:[%s3762_s3 + $0x60] sm:$0xff] %v1431_v4  ;;  %v1402_v25 = vmul.f32 %v3739_v7, %v1152_v15  ;;  %v1406_v29 = vmul.f32 %v3739_v7, %v1176_v16  ;;  %v1154_v31 = vpop.f32.mrb[23].mxu0  ;;  %v1178_v36 = vpop.f32.mrb[23].mxu1  ;;  %p2822_p8 = pnand %p2821_p12, %p2815_p9 }
 0x2ce   : > { %1711 = vst [vmem:[%s3762_s3 + $0x28] sm:$0xff] %v1687_v33  ;;  %1715 = vst [vmem:[%s3762_s3 + $0x68] sm:$0xff] %v1691_v14  ;;  %v1662_v38 = vmul.f32 %v3739_v7, %v1154_v31  ;;  %v1666_v39 = vmul.f32 %v3739_v7, %v1178_v36 }
 0x2cf   : > { %v1428_v40 = vadd.f32 %v1420_v5, %v1402_v25  ;;  %v1432_v42 = vadd.f32 %v1424_v10, %v1406_v29 }
 0x2d0   : > { %v1688_v62 = vadd.f32 %v1680_v41, %v1662_v38  ;;  %v1692_v43 = vadd.f32 %v1684_v20, %v1666_v39 }
 0x2d1   : > { %1452 = vst [vmem:[%s3762_s3 + $0x30] sm:$0xff] %v1428_v40  ;;  %1456 = vst [vmem:[%s3762_s3 + $0x70] sm:$0xff] %v1432_v42 }
 0x2d2   : > { %1712 = vst [vmem:[%s3762_s3 + $0x38] sm:$0xff] %v1688_v62  ;;  %1716 = vst [vmem:[%s3762_s3 + $0x78] sm:$0xff] %v1692_v43 }
 0x310   : > { %v1206_v44 = vpop.xlane.xlu0 %1205 }
 0x311   : > { %v1221_v45 = vmul.f32 0.0078125, %v1206_v44  ;;  %v1466_v46 = vpop.xlane.xlu1 %1465 }
 0x312   : > { %v1481_v49 = vmul.f32 0.0078125, %v1466_v46 }
 0x313   : > { %v1229_v48 = vadd.f32 1.1920929e-07, %v1221_v45 }
 0x314   : > { %v1310_v50 = vpop.xlane.xlu0 %1309  ;;  %v1489_v54 = vadd.f32 1.1920929e-07, %v1481_v49 }
 0x315   : > { %2544 = vrsqrt.f32 %v1229_v48  ;;  %v1325_v51 = vmul.f32 0.0078125, %v1310_v50  ;;  %v1208_v52 = vpop.xlane.xlu1 %1207 }
 0x316   : > { %v1222_v53 = vmul.f32 0.0078125, %v1208_v52 }
 0x317   : > { %v1333_v7 = vadd.f32 1.1920929e-07, %v1325_v51 }
 0x318   : > { %v1230_v55 = vadd.f32 1.1920929e-07, %v1222_v53  ;;  %v1570_v63 = vpop.xlane.xlu0 %1569 }
 0x319   : > { %2546 = vrsqrt.f32 %v1333_v7  ;;  %v1585_v4 = vmul.f32 0.0078125, %v1570_v63  ;;  %v1312_v5 = vpop.xlane.xlu1 %1311 }
 0x31a   : > { %2548 = vrsqrt.f32 %v1230_v55  ;;  %v1326_v10 = vmul.f32 0.0078125, %v1312_v5 }
 0x31b   : > { %2550 = vrsqrt.f32 %v1489_v54  ;;  %v1593_v33 = vadd.f32 1.1920929e-07, %v1585_v4 }
 0x31c   : > { %v1334_v14 = vadd.f32 1.1920929e-07, %v1326_v10  ;;  %v1468_v15 = vpop.xlane.xlu0 %1467 }
 0x31d   : > { %v1482_v16 = vmul.f32 0.0078125, %v1468_v15  ;;  %v1572_v41 = vpop.xlane.xlu1 %1571 }
 0x31e   : > { %2552 = vrsqrt.f32 %v1334_v14  ;;  %v1586_v20 = vmul.f32 0.0078125, %v1572_v41 }
 0x31f   : > { %v2545_v25 = vpop.eup %2544  ;;  %2554 = vrsqrt.f32 %v1593_v33  ;;  %v1490_v29 = vadd.f32 1.1920929e-07, %v1482_v16 }
 0x320   : > { %v1594_v31 = vadd.f32 1.1920929e-07, %v1586_v20  ;;  %v1210_v36 = vpop.xlane.xlu0 %1209  ;;  %v3807_v38 = vmul.f32 %v2545_v25, %v3607_v56 }
 0x321   : > { %2556 = vrsqrt.f32 %v1490_v29  ;;  %v1223_v39 = vmul.f32 0.0078125, %v1210_v36  ;;  %v1212_v40 = vpop.xlane.xlu1 %1211 }
 0x322   : > { %1261 = vrot.lane.b32.xlu0 %v3807_v38, %s3008_s14  ;;  %2558 = vrsqrt.f32 %v1594_v31  ;;  %v1224_v50 = vmul.f32 0.0078125, %v1212_v40 }
 0x323   : > { %v2547_v42 = vpop.eup %2546  ;;  %v1231_v43 = vadd.f32 1.1920929e-07, %v1223_v39 }
 0x324   : > { %v2549_v62 = vpop.eup %2548  ;;  %v1314_v44 = vpop.xlane.xlu0 %1313  ;;  %v3812_v45 = vmul.f32 %v2547_v42, %v3609_v58  ;;  %v1232_v4 = vadd.f32 1.1920929e-07, %v1224_v50 }
 0x325   : > { %v2551_v46 = vpop.eup %2550  ;;  %v1327_v48 = vmul.f32 0.0078125, %v1314_v44  ;;  %v1316_v49 = vpop.xlane.xlu1 %1315  ;;  %v3815_v56 = vmul.f32 %v2549_v62, %v3619_v0  ;;  %2560 = vrsqrt.f32 %v1231_v43 }
 0x326   : > { %1365 = vrot.lane.b32.xlu0 %v3812_v45, %s3008_s14  ;;  %v3822_v58 = vmul.f32 %v2551_v46, %v3611_v59  ;;  %v1328_v10 = vmul.f32 0.0078125, %v1316_v49 }
 0x327   : > { %1263 = vrot.lane.b32.xlu1 %v3815_v56, %s3008_s14  ;;  %v1335_v52 = vadd.f32 1.1920929e-07, %v1327_v48 }
 0x328   : > { %v2553_v51 = vpop.eup %2552  ;;  %v1470_v53 = vpop.xlane.xlu0 %1469  ;;  %v1336_v20 = vadd.f32 1.1920929e-07, %v1328_v10 }
 0x329   : > { %v2555_v54 = vpop.eup %2554  ;;  %v1483_v7 = vmul.f32 0.0078125, %v1470_v53  ;;  %v1576_v55 = vpop.xlane.xlu1 %1575  ;;  %v3825_v0 = vmul.f32 %v2553_v51, %v3621_v1  ;;  %2562 = vrsqrt.f32 %v1335_v52 }
 0x32a   : > { %1521 = vrot.lane.b32.xlu0 %v3822_v58, %s3008_s14  ;;  %v3832_v59 = vmul.f32 %v2555_v54, %v3613_v61  ;;  %v1588_v36 = vmul.f32 0.0078125, %v1576_v55 }
 0x32b   : > { %v2557_v63 = vpop.eup %2556  ;;  %v1491_v5 = vadd.f32 1.1920929e-07, %v1483_v7  ;;  %1367 = vrot.lane.b32.xlu1 %v3825_v0, %s3008_s14 }
 0x32c   : > { %v1574_v33 = vpop.xlane.xlu0 %1573  ;;  %v3835_v14 = vmul.f32 %v2557_v63, %v3623_v2  ;;  %v2559_v16 = vpop.eup %2558 }
 0x32d   : > { %2564 = vrsqrt.f32 %v1491_v5  ;;  %v1587_v1 = vmul.f32 0.0078125, %v1574_v33  ;;  %v1474_v15 = vpop.xlane.xlu1 %1473  ;;  %v3842_v2 = vmul.f32 %v2559_v16, %v3625_v3  ;;  %v1596_v3 = vadd.f32 1.1920929e-07, %v1588_v36 }
 0x32e   : > { %1625 = vrot.lane.b32.xlu0 %v3832_v59, %s3008_s14  ;;  %2566 = vrsqrt.f32 %v1232_v4  ;;  %v1485_v48 = vmul.f32 0.0078125, %v1474_v15 }
 0x32f   : > { %v1595_v41 = vadd.f32 1.1920929e-07, %v1587_v1  ;;  %1523 = vrot.lane.b32.xlu1 %v3835_v14, %s3008_s14  ;;  %v2561_v31 = vpop.eup %2560 }
 0x330   : > { %v1472_v25 = vpop.xlane.xlu0 %1471  ;;  %v3847_v43 = vmul.f32 %v2561_v31, %v3631_v26  ;;  %v1493_v63 = vadd.f32 1.1920929e-07, %v1485_v48 }
 0x331   : > { %2568 = vrsqrt.f32 %v1595_v41  ;;  %v1484_v61 = vmul.f32 0.0078125, %v1472_v25  ;;  %v1216_v29 = vpop.xlane.xlu1 %1215 }
 0x332   : > { %2570 = vrsqrt.f32 %v1336_v20  ;;  %v1226_v50 = vmul.f32 0.0078125, %v1216_v29 }
 0x333   : > { %1627 = vrot.lane.b32.xlu1 %v3842_v2, %s3008_s14  ;;  %v1492_v39 = vadd.f32 1.1920929e-07, %v1484_v61  ;;  %v2563_v44 = vpop.eup %2562 }
 0x334   : > { %v1214_v40 = vpop.xlane.xlu0 %1213  ;;  %v3855_v26 = vmul.f32 %v2563_v44, %v3633_v6  ;;  %v1234_v5 = vadd.f32 1.1920929e-07, %v1226_v50 }
 0x335   : > { %v1225_v42 = vmul.f32 0.0078125, %v1214_v40  ;;  %v1320_v62 = vpop.xlane.xlu1 %1319  ;;  %2572 = vrsqrt.f32 %v1492_v39 }
 0x337   : > { %v2565_v46 = vpop.eup %2564  ;;  %v1233_v49 = vadd.f32 1.1920929e-07, %v1225_v42  ;;  %1265 = vrot.lane.b32.xlu1 %v3847_v43, %s3008_s14 }
 0x338   : > { %v1318_v51 = vpop.xlane.xlu0 %1317  ;;  %v3852_v52 = vmul.f32 %v2565_v46, %v3637_v8  ;;  %v2567_v7 = vpop.eup %2566  ;;  %v1330_v8 = vmul.f32 0.0078125, %v1320_v62 }
 0x339   : > { %2574 = vrsqrt.f32 %v1233_v49  ;;  %v1329_v53 = vmul.f32 0.0078125, %v1318_v51  ;;  %v1580_v54 = vpop.xlane.xlu1 %1579  ;;  %v3865_v15 = vmul.f32 %v2567_v7, %v3643_v11 }
 0x33a   : > { %1525 = vrot.lane.b32.xlu0 %v3852_v52, %s3008_s14  ;;  %2576 = vrsqrt.f32 %v1596_v3  ;;  %v1338_v20 = vadd.f32 1.1920929e-07, %v1330_v8  ;;  %v1590_v36 = vmul.f32 0.0078125, %v1580_v54 }
 0x33b   : > { %v2569_v55 = vpop.eup %2568  ;;  %v1337_v4 = vadd.f32 1.1920929e-07, %v1329_v53  ;;  %1369 = vrot.lane.b32.xlu1 %v3855_v26, %s3008_s14 }
 0x33c   : > { %v1578_v10 = vpop.xlane.xlu0 %1577  ;;  %v3862_v33 = vmul.f32 %v2569_v55, %v3639_v9  ;;  %v2571_v16 = vpop.eup %2570  ;;  %v1598_v3 = vadd.f32 1.1920929e-07, %v1590_v36 }
 0x33d   : > { %2578 = vrsqrt.f32 %v1337_v4  ;;  %v1589_v6 = vmul.f32 0.0078125, %v1578_v10  ;;  %v1478_v1 = vpop.xlane.xlu1 %1477  ;;  %v3872_v61 = vmul.f32 %v2571_v16, %v3645_v27 }
 0x33e   : > { %1629 = vrot.lane.b32.xlu0 %v3862_v33, %s3008_s14  ;;  %2580 = vrsqrt.f32 %v1493_v63  ;;  %v1487_v48 = vmul.f32 0.0078125, %v1478_v1 }
 0x33f   : > { %v1597_v41 = vadd.f32 1.1920929e-07, %v1589_v6  ;;  %1267 = vrot.lane.b32.xlu1 %v3865_v15, %s3008_s14  ;;  %2582 = vrsqrt.f32 %v1234_v5  ;;  %v2573_v29 = vpop.eup %2572 }
 0x340   : > { %v1476_v25 = vpop.xlane.xlu0 %1475  ;;  %v3880_v44 = vmul.f32 %v2573_v29, %v3651_v13  ;;  %v1495_v63 = vadd.f32 1.1920929e-07, %v1487_v48 }
 0x341   : > { %v1486_v9 = vmul.f32 0.0078125, %v1476_v25  ;;  %2584 = vrsqrt.f32 %v1597_v41  ;;  %v1220_v11 = vpop.xlane.xlu1 %1219 }
 0x342   : > { %2586 = vrsqrt.f32 %v1338_v20  ;;  %v1228_v50 = vmul.f32 0.0078125, %v1220_v11 }
 0x343   : > { %v2575_v31 = vpop.eup %2574  ;;  %1371 = vrot.lane.b32.xlu1 %v3872_v61, %s3008_s14  ;;  %v1494_v39 = vadd.f32 1.1920929e-07, %v1486_v9 }
 0x344   : > { %v1218_v40 = vpop.xlane.xlu0 %1217  ;;  %v3877_v42 = vmul.f32 %v2575_v31, %v3659_v17  ;;  %v2577_v27 = vpop.eup %2576  ;;  %v1236_v5 = vadd.f32 1.1920929e-07, %v1228_v50 }
 0x345   : > { %v1227_v62 = vmul.f32 0.0078125, %v1218_v40  ;;  %2588 = vrsqrt.f32 %v1494_v39  ;;  %v1324_v13 = vpop.xlane.xlu1 %1323  ;;  %v3890_v7 = vmul.f32 %v2577_v27, %v3649_v12 }
 0x346   : > { %1269 = vrot.lane.b32.xlu0 %v3877_v42, %s3008_s14 }
 0x347   : > { %v2579_v46 = vpop.eup %2578  ;;  %v1235_v49 = vadd.f32 1.1920929e-07, %v1227_v62  ;;  %1527 = vrot.lane.b32.xlu1 %v3880_v44, %s3008_s14 }
 0x348   : > { %v1322_v51 = vpop.xlane.xlu0 %1321  ;;  %v3887_v17 = vmul.f32 %v2579_v46, %v3661_v18  ;;  %v2581_v53 = vpop.eup %2580  ;;  %v1332_v18 = vmul.f32 0.0078125, %v1324_v13 }
 0x349   : > { %2590 = vrsqrt.f32 %v1235_v49  ;;  %v1331_v54 = vmul.f32 0.0078125, %v1322_v51  ;;  %v2583_v55 = vpop.eup %2582  ;;  %v3897_v10 = vmul.f32 %v2581_v53, %v3663_v34  ;;  %v1584_v25 = vpop.xlane.xlu1 %1583 }
 0x34a   : > { %1373 = vrot.lane.b32.xlu0 %v3887_v17, %s3008_s14  ;;  %2592 = vrsqrt.f32 %v1598_v3  ;;  %v3900_v12 = vmul.f32 %v2583_v55, %v3671_v21  ;;  %v1340_v16 = vadd.f32 1.1920929e-07, %v1332_v18  ;;  %v1592_v36 = vmul.f32 0.0078125, %v1584_v25 }
 0x34b   : > { %v1339_v4 = vadd.f32 1.1920929e-07, %v1331_v54  ;;  %1631 = vrot.lane.b32.xlu1 %v3890_v7, %s3008_s14  ;;  %v2585_v6 = vpop.eup %2584 }
 0x34c   : > { %v1480_v8 = vpop.xlane.xlu0 %1479  ;;  %v2587_v1 = vpop.eup %2586  ;;  %v3907_v34 = vmul.f32 %v2585_v6, %v3665_v19  ;;  %v1600_v27 = vadd.f32 1.1920929e-07, %v1592_v36 }
 0x34d   : > { %2594 = vrsqrt.f32 %v1339_v4  ;;  %v1488_v41 = vmul.f32 0.0078125, %v1480_v8  ;;  %v3910_v21 = vmul.f32 %v2587_v1, %v3673_v22 }
 0x34e   : > { %1529 = vrot.lane.b32.xlu0 %v3897_v10, %s3008_s14  ;;  %2596 = vrsqrt.f32 %v1495_v63 }
 0x34f   : > { %1271 = vrot.lane.b32.xlu1 %v3900_v12, %s3008_s14  ;;  %2598 = vrsqrt.f32 %v1236_v5  ;;  %v2589_v29 = vpop.eup %2588  ;;  %v1496_v39 = vadd.f32 1.1920929e-07, %v1488_v41 }
 0x350   : > { %v1582_v20 = vpop.xlane.xlu0 %1581  ;;  %2600 = vrsqrt.f32 %v1340_v16  ;;  %v3920_v40 = vmul.f32 %v2589_v29, %v3677_v24 }
 0x351   : > { %v1591_v9 = vmul.f32 0.0078125, %v1582_v20 }
 0x352   : > { %1633 = vrot.lane.b32.xlu0 %v3907_v34, %s3008_s14 }
 0x353   : > { %v2591_v31 = vpop.eup %2590  ;;  %v1599_v11 = vadd.f32 1.1920929e-07, %v1591_v9  ;;  %1375 = vrot.lane.b32.xlu1 %v3910_v21, %s3008_s14 }
 0x354   : > { %v3917_v19 = vmul.f32 %v2591_v31, %v3681_v28  ;;  %v2593_v22 = vpop.eup %2592 }
 0x355   : > { %2602 = vrsqrt.f32 %v1599_v11  ;;  %v3930_v28 = vmul.f32 %v2593_v22, %v3675_v23 }
 0x356   : > { %1273 = vrot.lane.b32.xlu0 %v3917_v19, %s3008_s14  ;;  %2604 = vrsqrt.f32 %v1496_v39 }
 0x357   : > { %v2595_v62 = vpop.eup %2594  ;;  %1531 = vrot.lane.b32.xlu1 %v3920_v40, %s3008_s14  ;;  %2606 = vrsqrt.f32 %v1600_v27 }
 0x358   : > { %v3927_v46 = vmul.f32 %v2595_v62, %v3683_v47  ;;  %v2597_v48 = vpop.eup %2596 }
 0x359   : > { %v2599_v24 = vpop.eup %2598  ;;  %v3937_v49 = vmul.f32 %v2597_v48, %v3687_v57 }
 0x35a   : > { %1377 = vrot.lane.b32.xlu0 %v3927_v46, %s3008_s14  ;;  %v3940_v47 = vmul.f32 %v2599_v24, %v3693_v32  ;;  %v2601_v3 = vpop.eup %2600 }
 0x35b   : > { %1635 = vrot.lane.b32.xlu1 %v3930_v28, %s3008_s14  ;;  %v3950_v51 = vmul.f32 %v2601_v3, %v3695_v35 }
 0x35e   : > { %1533 = vrot.lane.b32.xlu0 %v3937_v49, %s3008_s14 }
 0x35f   : > { %v2603_v23 = vpop.eup %2602  ;;  %1275 = vrot.lane.b32.xlu1 %v3940_v47, %s3008_s14 }
 0x360   : > { %v3947_v50 = vmul.f32 %v2603_v23, %v3689_v30  ;;  %v2605_v57 = vpop.eup %2604 }
 0x361   : > { %v3960_v32 = vmul.f32 %v2605_v57, %v3701_v60  ;;  %v2607_v53 = vpop.eup %2606 }
 0x362   : > { %1637 = vrot.lane.b32.xlu0 %v3947_v50, %s3008_s14  ;;  %v3974_v30 = vmul.f32 %v2607_v53, %v3699_v37 }
 0x363   : > { %1379 = vrot.lane.b32.xlu1 %v3950_v51, %s3008_s14 }
 0x367   : > { %1535 = vrot.lane.b32.xlu1 %v3960_v32, %s3008_s14 }
 0x368   : > { %2825 = shalt.err (!%p2822_p8)
}
 0x369   : > { %s2826_s28 = scalar_lea.hbm %s3966_s17, 1024  ;;  %s2830_s12 = scalar_lea.hbm %s4290_s6, 2048 }
 0x36a   : > { %p2827_p4 = scmp.ne.s32.totalorder %s3966_s17, %s2826_s28  ;;  %p2831_p6 = scmp.lt.u32.totalorder %s3966_s17, %s4290_s6 }
 0x36b   : > { %p2832_p5 = scmp.lt.u32.totalorder %s2830_s12, %s2826_s28  ;;  %p2834_p2 = scmp.lt.u32.totalorder %s2826_s28, %s3966_s17 }
 0x36c   : > { %p2828_p11 = pnand %p2827_p4, %p4291_p0 }
 0x36d   : > { %p2833_p3 = por %p2832_p5, %p2831_p6 }
 0x36e   : > { %p2829_p13 = pneg %p2828_p11 }
 0x36f   : > { %p2835_p7 = por %p2834_p2, %p2833_p3 }
 0x371   : > { %p2836_p9 = pnand %p2835_p7, %p2829_p13 }
 0x373   : > { %2839 = shalt.err (!%p2836_p9)
}
 0x374   : > { %s3010_s21 = smov 128   ;;  %s3011_s11 = smov 8   ;;  %1639 = vrot.lane.b32.xlu1 %v3974_v30, %s3008_s14 }
 0x375   : > { %2429 = dma.vmem_to_hbm [thread:$0]  (%p4291_p0), %s3971_s25, 1024, %s3966_s17, %s1718_s26, %s3010_s21, %s3010_s21, %s3011_s11  }
 0x376   : > { %s4292_s28 = sld [smem:[#allocation44_spill]]  ;;  %s1797_s29 = sshll.u32 %s3762_s3, 4  ;;  %s4009_s29 = int_to_ptr.vmem [resolvable:$true] %s1797_s29 }
 0x377   : > { %s1733_s12 = scalar_lea.sflag [#allocation22], %s3426_s22  ;;  %s2840_s16 = scalar_lea.vmem %s4009_s29, 2048 }
 0x378   : > { %p2841_p1 = scmp.ne.s32.totalorder %s4009_s29, %s2840_s16  ;;  %s3012_s17 = smov [#allocation21]  }
 0x379   : > { %s2844_s25 = sshll.u32 %s3012_s17, 4  ;;  %s2845_s25 = int_to_ptr.vmem [resolvable:$false] %s2844_s25 }
 0x37a   : > { %p2842_p10 = pnand %p2841_p1, %p4291_p0  ;;  %s2846_s14 = scalar_lea.vmem %s2845_s25, 4096 }
 0x37b   : > { %p2847_p8 = scmp.lt.s32.totalorder %s4009_s29, %s2845_s25  ;;  %p2848_p4 = scmp.lt.s32.totalorder %s2846_s14, %s2840_s16 }
 0x37c   : > { %s4006_s8 = scalar_lea.hbm %s4292_s28, %s3957_s13  ;;  %p2843_p12 = pneg %p2842_p10 }
 0x37d   : > { %p2849_p11 = por %p2848_p4, %p2847_p8 }
 0x37f   : > { %p2850_p13 = pnand %p2849_p11, %p2843_p12 }
 0x381   : > { %2853 = shalt.err (!%p2850_p13)
}
 0x382   : > { %s2854_s3 = scalar_lea.hbm %s4006_s8, 2048  ;;  %s2858_s21 = scalar_lea.hbm %s4292_s28, 4096 }
 0x383   : > { %p2855_p6 = scmp.ne.s32.totalorder %s4006_s8, %s2854_s3  ;;  %p2859_p2 = scmp.lt.u32.totalorder %s4006_s8, %s4292_s28 }
 0x384   : > { %p2860_p7 = scmp.lt.u32.totalorder %s2858_s21, %s2854_s3  ;;  %p2862_p1 = scmp.lt.u32.totalorder %s2854_s3, %s4006_s8 }
 0x385   : > { %p2856_p5 = pnand %p2855_p6, %p4291_p0 }
 0x386   : > { %p2861_p9 = por %p2860_p7, %p2859_p2 }
 0x387   : > { %p2857_p3 = pneg %p2856_p5 }
 0x388   : > { %p2863_p10 = por %p2862_p1, %p2861_p9 }
 0x38a   : > { %p2864_p12 = pnand %p2863_p10, %p2857_p3 }
 0x38c   : > { %2867 = shalt.err (!%p2864_p12)
}
 0x38d   : > { %s3013_s10 = smov 256   ;;  %s3014_s16 = smov 16   ;;  %v1181_v35 = vld [vmem:[%s3451_s9] sm:$0xff]  ;;  %v1182_v63 = vld [vmem:[%s3451_s9 + $0x8] sm:$0xff] }
 0x38e   : > { %2432 = dma.vmem_to_hbm [thread:$0]  (%p4291_p0), %s4009_s29, 2048, %s4006_s8, %s1733_s12, %s3013_s10, %s3013_s10, %s3014_s16   ;;  %v1253_v13 = vmul.f32 %v3807_v38, %v1181_v35  ;;  %v1357_v8 = vmul.f32 %v3812_v45, %v1181_v35  ;;  %v1254_v16 = vmul.f32 %v3815_v56, %v1182_v63  ;;  %v1513_v45 = vmul.f32 %v3822_v58, %v1181_v35 }
 0x38f   : > { %v1189_v37 = vld [vmem:[%s3455_s24] sm:$0xff]  ;;  %v1190_v4 = vld [vmem:[%s3455_s24 + $0x8] sm:$0xff]  ;;  %s4046_s22 = scalar_lea.vmem [#allocation18], %s3466_s19  ;;  %s4050_s8 = scalar_lea.vmem [#allocation20], %s3466_s19  ;;  %v1358_v31 = vmul.f32 %v3825_v0, %v1182_v63  ;;  %v1617_v27 = vmul.f32 %v3832_v59, %v1181_v35  ;;  %v1514_v24 = vmul.f32 %v3835_v14, %v1182_v63 }
 0x390   : > { %s4293_s12 = sld [smem:[#allocation42_spill]]  ;;  %s4294_s3 = sld [smem:[#allocation43_spill]] }
 0x391   : > { %s1723_s30 = scalar_lea.sflag [#allocation19], %s3440_s27  ;;  %s3015_s11 = smov [#allocation18]  }
 0x392   : > { %s2872_s15 = sshll.u32 %s3015_s11, 4  ;;  %s2873_s15 = int_to_ptr.vmem [resolvable:$false] %s2872_s15 }
 0x393   : > { %s2874_s19 = scalar_lea.vmem %s2873_s15, 4096 }
 0x394   : > { %v1262_v60 = vpop.permute.xlu0 %1261 }
 0x395   : > { %v1277_v54 = vmul.f32 %v1262_v60, %v1189_v37  ;;  %v1618_v60 = vmul.f32 %v3842_v2, %v1182_v63 }
 0x396   : > { %s4128_s17 = scalar_lea.hbm %s4293_s12, %s3957_s13  ;;  %s4137_s26 = scalar_lea.hbm %s4294_s3, %s3957_s13 }
 0x397   : > { %v1285_v55 = vadd.f32 %v1277_v54, %v1253_v13  ;;  %v1183_v54 = vld [vmem:[%s3451_s9 + $0x10] sm:$0xff] }
 0x398   : > { %v1366_v5 = vpop.permute.xlu0 %1365  ;;  %v1255_v14 = vmul.f32 %v3847_v43, %v1183_v54 }
 0x399   : > { %v1293_v18 = vmul.f32 0.12, %v1285_v55  ;;  %v1381_v6 = vmul.f32 %v1366_v5, %v1189_v37  ;;  %v1264_v1 = vpop.permute.xlu1 %1263  ;;  %v1191_v55 = vld [vmem:[%s3455_s24 + $0x10] sm:$0xff] }
 0x39a   : > { %v1278_v41 = vmul.f32 %v1264_v1, %v1190_v4 }
 0x39b   : > { %1433 = vst [vmem:[%s4046_s22] sm:$0xff] %v1293_v18  ;;  %v1389_v38 = vadd.f32 %v1381_v6, %v1357_v8  ;;  %v1515_v8 = vmul.f32 %v3852_v52, %v1183_v54  ;;  %v1619_v52 = vmul.f32 %v3862_v33, %v1183_v54 }
 0x39c   : > { %v1286_v20 = vadd.f32 %v1278_v41, %v1254_v16  ;;  %v1522_v25 = vpop.permute.xlu0 %1521  ;;  %v1184_v41 = vld [vmem:[%s3451_s9 + $0x18] sm:$0xff] }
 0x39d   : > { %1441 = vst [vmem:[%s4050_s8] sm:$0xff] %v1389_v38  ;;  %v1537_v9 = vmul.f32 %v1522_v25, %v1189_v37  ;;  %v1368_v29 = vpop.permute.xlu1 %1367  ;;  %v1192_v38 = vld [vmem:[%s3455_s24 + $0x18] sm:$0xff] }
 0x39e   : > { %v1294_v56 = vmul.f32 0.12, %v1286_v20  ;;  %v1382_v11 = vmul.f32 %v1368_v29, %v1190_v4  ;;  %v1256_v29 = vmul.f32 %v3865_v15, %v1184_v41 }
 0x39f   : > { %v1545_v36 = vadd.f32 %v1537_v9, %v1513_v45 }
 0x3a0   : > { %1434 = vst [vmem:[%s4046_s22 + $0x10] sm:$0xff] %v1294_v56  ;;  %v1390_v39 = vadd.f32 %v1382_v11, %v1358_v31  ;;  %v1626_v22 = vpop.permute.xlu0 %1625 }
 0x3a1   : > { %v1553_v62 = vmul.f32 0.12, %v1545_v36  ;;  %v1641_v48 = vmul.f32 %v1626_v22, %v1189_v37  ;;  %v1524_v58 = vpop.permute.xlu1 %1523 }
 0x3a2   : > { %1442 = vst [vmem:[%s4050_s8 + $0x10] sm:$0xff] %v1390_v39  ;;  %v1538_v3 = vmul.f32 %v1524_v58, %v1190_v4  ;;  %v1360_v39 = vmul.f32 %v3872_v61, %v1184_v41 }
 0x3a3   : > { %1693 = vst [vmem:[%s4046_s22 + $0x8] sm:$0xff] %v1553_v62  ;;  %v1649_v0 = vadd.f32 %v1641_v48, %v1617_v27  ;;  %v1193_v62 = vld [vmem:[%s3455_s24 + $0x20] sm:$0xff] }
 0x3a4   : > { %v1546_v23 = vadd.f32 %v1538_v3, %v1514_v24  ;;  %v1185_v27 = vld [vmem:[%s3451_s9 + $0x20] sm:$0xff]  ;;  %v1516_v3 = vmul.f32 %v3880_v44, %v1184_v41  ;;  %v1194_v44 = vld [vmem:[%s3455_s24 + $0x28] sm:$0xff] }
 0x3a5   : > { %1701 = vst [vmem:[%s4050_s8 + $0x8] sm:$0xff] %v1649_v0  ;;  %v1628_v57 = vpop.permute.xlu1 %1627  ;;  %v1257_v58 = vmul.f32 %v3877_v42, %v1185_v27 }
 0x3a6   : > { %v1554_v53 = vmul.f32 0.12, %v1546_v23  ;;  %v1642_v13 = vmul.f32 %v1628_v57, %v1190_v4  ;;  %v1359_v4 = vmul.f32 %v3855_v26, %v1183_v54 }
 0x3a8   : > { %1694 = vst [vmem:[%s4046_s22 + $0x18] sm:$0xff] %v1554_v53  ;;  %v1650_v59 = vadd.f32 %v1642_v13, %v1618_v60  ;;  %v1361_v60 = vmul.f32 %v3887_v17, %v1185_v27 }
 0x3a9   : > { %v1266_v35 = vpop.permute.xlu1 %1265 }
 0x3aa   : > { %1702 = vst [vmem:[%s4050_s8 + $0x18] sm:$0xff] %v1650_v59  ;;  %v1279_v37 = vmul.f32 %v1266_v35, %v1191_v55 }
 0x3ac   : > { %v1287_v5 = vadd.f32 %v1279_v37, %v1255_v14  ;;  %v1526_v18 = vpop.permute.xlu0 %1525  ;;  %v1186_v14 = vld [vmem:[%s3451_s9 + $0x28] sm:$0xff] }
 0x3ad   : > { %v1539_v6 = vmul.f32 %v1526_v18, %v1191_v55  ;;  %v1370_v2 = vpop.permute.xlu1 %1369  ;;  %v1517_v18 = vmul.f32 %v3897_v10, %v1185_v27 }
 0x3ae   : > { %v1295_v63 = vmul.f32 0.12, %v1287_v5  ;;  %v1383_v1 = vmul.f32 %v1370_v2, %v1191_v55 }
 0x3af   : > { %v1547_v16 = vadd.f32 %v1539_v6, %v1515_v8  ;;  %v1258_v6 = vmul.f32 %v3900_v12, %v1186_v14 }
 0x3b0   : > { %1435 = vst [vmem:[%s4046_s22 + $0x20] sm:$0xff] %v1295_v63  ;;  %v1391_v20 = vadd.f32 %v1383_v1, %v1359_v4  ;;  %v1630_v43 = vpop.permute.xlu0 %1629 }
 0x3b1   : > { %v1555_v25 = vmul.f32 0.12, %v1547_v16  ;;  %v1643_v45 = vmul.f32 %v1630_v43, %v1191_v55  ;;  %v1268_v9 = vpop.permute.xlu1 %1267  ;;  %v1620_v55 = vmul.f32 %v3890_v7, %v1184_v41  ;;  %v1621_v16 = vmul.f32 %v3907_v34, %v1185_v27 }
 0x3b2   : > { %1443 = vst [vmem:[%s4050_s8 + $0x20] sm:$0xff] %v1391_v20  ;;  %v1280_v26 = vmul.f32 %v1268_v9, %v1192_v38  ;;  %v1362_v20 = vmul.f32 %v3910_v21, %v1186_v14  ;;  %v1622_v27 = vmul.f32 %v3930_v28, %v1186_v14 }
 0x3b3   : > { %1695 = vst [vmem:[%s4046_s22 + $0x28] sm:$0xff] %v1555_v25  ;;  %v1651_v56 = vadd.f32 %v1643_v45, %v1619_v52  ;;  %v1195_v25 = vld [vmem:[%s3455_s24 + $0x30] sm:$0xff] }
 0x3b4   : > { %v1288_v31 = vadd.f32 %v1280_v26, %v1256_v29  ;;  %v1187_v45 = vld [vmem:[%s3451_s9 + $0x30] sm:$0xff] }
 0x3b5   : > { %1703 = vst [vmem:[%s4050_s8 + $0x28] sm:$0xff] %v1651_v56  ;;  %v1372_v11 = vpop.permute.xlu1 %1371  ;;  %v1259_v29 = vmul.f32 %v3917_v19, %v1187_v45  ;;  %v1518_v56 = vmul.f32 %v3920_v40, %v1186_v14  ;;  %v1196_v40 = vld [vmem:[%s3455_s24 + $0x38] sm:$0xff]  ;;  %s1780_s24 = sshll.u32 %s4050_s8, 4  ;;  %s4139_s24 = int_to_ptr.vmem [resolvable:$true] %s1780_s24 }
 0x3b6   : > { %v1296_v36 = vmul.f32 0.12, %v1288_v31  ;;  %v1384_v22 = vmul.f32 %v1372_v11, %v1192_v38 }
 0x3b8   : > { %1436 = vst [vmem:[%s4046_s22 + $0x30] sm:$0xff] %v1296_v36  ;;  %v1392_v33 = vadd.f32 %v1384_v22, %v1360_v39  ;;  %v1270_v48 = vpop.permute.xlu0 %1269  ;;  %v1363_v22 = vmul.f32 %v3927_v46, %v1187_v45 }
 0x3b9   : > { %v1281_v15 = vmul.f32 %v1270_v48, %v1193_v62  ;;  %v1528_v24 = vpop.permute.xlu1 %1527 }
 0x3ba   : > { %1444 = vst [vmem:[%s4050_s8 + $0x30] sm:$0xff] %v1392_v33  ;;  %v1540_v0 = vmul.f32 %v1528_v24, %v1192_v38 }
 0x3bb   : > { %v1289_v23 = vadd.f32 %v1281_v15, %v1257_v58  ;;  %v1188_v15 = vld [vmem:[%s3451_s9 + $0x38] sm:$0xff]  ;;  %s1763_s9 = sshll.u32 %s4046_s22, 4  ;;  %s4130_s9 = int_to_ptr.vmem [resolvable:$true] %s1763_s9 }
 0x3bc   : > { %v1548_v61 = vadd.f32 %v1540_v0, %v1516_v3  ;;  %v1374_v57 = vpop.permute.xlu0 %1373  ;;  %v1519_v0 = vmul.f32 %v3937_v49, %v1187_v45  ;;  %s2868_s21 = scalar_lea.vmem %s4130_s9, 2048  ;;  %p2875_p13 = scmp.lt.s32.totalorder %s4130_s9, %s2873_s15 }
 0x3bd   : > { %v1297_v53 = vmul.f32 0.12, %v1289_v23  ;;  %v1385_v13 = vmul.f32 %v1374_v57, %v1193_v62  ;;  %v1632_v42 = vpop.permute.xlu1 %1631  ;;  %p2869_p8 = scmp.ne.s32.totalorder %s4130_s9, %s2868_s21  ;;  %p2876_p6 = scmp.lt.s32.totalorder %s2874_s19, %s2868_s21 }
 0x3be   : > { %v1556_v54 = vmul.f32 0.12, %v1548_v61  ;;  %v1644_v59 = vmul.f32 %v1632_v42, %v1192_v38  ;;  %v1260_v61 = vmul.f32 %v3940_v47, %v1188_v15  ;;  %v1623_v42 = vmul.f32 %v3947_v50, %v1187_v45 }
 0x3bf   : > { %1437 = vst [vmem:[%s4046_s22 + $0x40] sm:$0xff] %v1297_v53  ;;  %v1393_v35 = vadd.f32 %v1385_v13, %v1361_v60  ;;  %v1520_v50 = vmul.f32 %v3960_v32, %v1188_v15  ;;  %p2870_p4 = pnand %p2869_p8, %p4291_p0  ;;  %p2877_p5 = por %p2876_p6, %p2875_p13 }
 0x3c0   : > { %1696 = vst [vmem:[%s4046_s22 + $0x38] sm:$0xff] %v1556_v54  ;;  %v1652_v37 = vadd.f32 %v1644_v59, %v1620_v55  ;;  %v1530_v5 = vpop.permute.xlu0 %1529  ;;  %v1364_v59 = vmul.f32 %v3950_v51, %v1188_v15 }
 0x3c1   : > { %1445 = vst [vmem:[%s4050_s8 + $0x40] sm:$0xff] %v1393_v35  ;;  %v1541_v8 = vmul.f32 %v1530_v5, %v1193_v62  ;;  %v1272_v17 = vpop.permute.xlu1 %1271  ;;  %p2871_p11 = pneg %p2870_p4 }
 0x3c2   : > { %1704 = vst [vmem:[%s4050_s8 + $0x38] sm:$0xff] %v1652_v37  ;;  %v1282_v7 = vmul.f32 %v1272_v17, %v1194_v44 }
 0x3c3   : > { %v1549_v2 = vadd.f32 %v1541_v8, %v1517_v18  ;;  %v1624_v8 = vmul.f32 %v3974_v30, %v1188_v15  ;;  %p2878_p3 = pnand %p2877_p5, %p2871_p11 }
 0x3c4   : > { %v1290_v63 = vadd.f32 %v1282_v7, %v1258_v6  ;;  %v1634_v4 = vpop.permute.xlu0 %1633 }
 0x3c5   : > { %v1557_v1 = vmul.f32 0.12, %v1549_v2  ;;  %v1645_v41 = vmul.f32 %v1634_v4, %v1193_v62  ;;  %v1376_v10 = vpop.permute.xlu1 %1375 }
 0x3c6   : > { %v1298_v38 = vmul.f32 0.12, %v1290_v63  ;;  %v1386_v43 = vmul.f32 %v1376_v10, %v1194_v44 }
 0x3c7   : > { %1697 = vst [vmem:[%s4046_s22 + $0x48] sm:$0xff] %v1557_v1  ;;  %v1653_v52 = vadd.f32 %v1645_v41, %v1621_v16 }
 0x3c8   : > { %1438 = vst [vmem:[%s4046_s22 + $0x50] sm:$0xff] %v1298_v38  ;;  %v1394_v12 = vadd.f32 %v1386_v43, %v1362_v20  ;;  %v1274_v9 = vpop.permute.xlu0 %1273 }
 0x3c9   : > { %1705 = vst [vmem:[%s4050_s8 + $0x48] sm:$0xff] %v1653_v52  ;;  %v1283_v26 = vmul.f32 %v1274_v9, %v1195_v25  ;;  %v1532_v34 = vpop.permute.xlu1 %1531 }
 0x3ca   : > { %1446 = vst [vmem:[%s4050_s8 + $0x50] sm:$0xff] %v1394_v12  ;;  %v1542_v21 = vmul.f32 %v1532_v34, %v1194_v44 }
 0x3cb   : > { %v1291_v31 = vadd.f32 %v1283_v26, %v1259_v29 }
 0x3cc   : > { %v1550_v11 = vadd.f32 %v1542_v21, %v1518_v56  ;;  %v1378_v36 = vpop.permute.xlu0 %1377 }
 0x3cd   : > { %v1299_v39 = vmul.f32 0.12, %v1291_v31  ;;  %v1387_v62 = vmul.f32 %v1378_v36, %v1195_v25  ;;  %v1636_v19 = vpop.permute.xlu1 %1635 }
 0x3ce   : > { %v1558_v33 = vmul.f32 0.12, %v1550_v11  ;;  %v1646_v48 = vmul.f32 %v1636_v19, %v1194_v44 }
 0x3cf   : > { %1439 = vst [vmem:[%s4046_s22 + $0x60] sm:$0xff] %v1299_v39  ;;  %v1395_v58 = vadd.f32 %v1387_v62, %v1363_v22 }
 0x3d0   : > { %1698 = vst [vmem:[%s4046_s22 + $0x58] sm:$0xff] %v1558_v33  ;;  %v1654_v24 = vadd.f32 %v1646_v48, %v1622_v27  ;;  %v1534_v3 = vpop.permute.xlu0 %1533 }
 0x3d1   : > { %1447 = vst [vmem:[%s4050_s8 + $0x60] sm:$0xff] %v1395_v58  ;;  %v1543_v23 = vmul.f32 %v1534_v3, %v1195_v25  ;;  %v1276_v46 = vpop.permute.xlu1 %1275 }
 0x3d2   : > { %1706 = vst [vmem:[%s4050_s8 + $0x58] sm:$0xff] %v1654_v24  ;;  %v1284_v28 = vmul.f32 %v1276_v46, %v1196_v40 }
 0x3d3   : > { %v1551_v57 = vadd.f32 %v1543_v23, %v1519_v0 }
 0x3d4   : > { %v1292_v53 = vadd.f32 %v1284_v28, %v1260_v61  ;;  %v1638_v60 = vpop.permute.xlu0 %1637 }
 0x3d5   : > { %v1559_v13 = vmul.f32 0.12, %v1551_v57  ;;  %v1647_v54 = vmul.f32 %v1638_v60, %v1195_v25  ;;  %v1380_v55 = vpop.permute.xlu1 %1379 }
 0x3d6   : > { %v1300_v49 = vmul.f32 0.12, %v1292_v53  ;;  %v1388_v35 = vmul.f32 %v1380_v55, %v1196_v40 }
 0x3d7   : > { %1699 = vst [vmem:[%s4046_s22 + $0x68] sm:$0xff] %v1559_v13  ;;  %v1655_v47 = vadd.f32 %v1647_v54, %v1623_v42 }
 0x3d8   : > { %1440 = vst [vmem:[%s4046_s22 + $0x70] sm:$0xff] %v1300_v49  ;;  %v1396_v14 = vadd.f32 %v1388_v35, %v1364_v59 }
 0x3d9   : > { %1707 = vst [vmem:[%s4050_s8 + $0x68] sm:$0xff] %v1655_v47  ;;  %v1536_v44 = vpop.permute.xlu1 %1535 }
 0x3da   : > { %1448 = vst [vmem:[%s4050_s8 + $0x70] sm:$0xff] %v1396_v14  ;;  %v1544_v37 = vmul.f32 %v1536_v44, %v1196_v40 }
 0x3dc   : > { %v1552_v5 = vadd.f32 %v1544_v37, %v1520_v50 }
 0x3de   : > { %v1560_v51 = vmul.f32 0.12, %v1552_v5 }
 0x3e0   : > { %1700 = vst [vmem:[%s4046_s22 + $0x78] sm:$0xff] %v1560_v51 }
 0x3e6   : > { %v1640_v18 = vpop.permute.xlu1 %1639 }
 0x3e7   : > { %v1648_v17 = vmul.f32 %v1640_v18, %v1196_v40 }
 0x3e9   : > { %v1656_v32 = vadd.f32 %v1648_v17, %v1624_v8 }
 0x3ea   : > { %2881 = shalt.err (!%p2878_p3)
}
 0x3eb   : > { %s2882_s13 = scalar_lea.hbm %s4128_s17, 2048  ;;  %s2886_s25 = scalar_lea.hbm %s4293_s12, 4096 }
 0x3ec   : > { %p2883_p2 = scmp.ne.s32.totalorder %s4128_s17, %s2882_s13  ;;  %p2887_p1 = scmp.lt.u32.totalorder %s4128_s17, %s4293_s12 }
 0x3ed   : > { %p2888_p10 = scmp.lt.u32.totalorder %s2886_s25, %s2882_s13  ;;  %p2890_p8 = scmp.lt.u32.totalorder %s2882_s13, %s4128_s17 }
 0x3ee   : > { %p2884_p7 = pnand %p2883_p2, %p4291_p0 }
 0x3ef   : > { %p2889_p12 = por %p2888_p10, %p2887_p1 }
 0x3f0   : > { %p2885_p9 = pneg %p2884_p7 }
 0x3f1   : > { %p2891_p4 = por %p2890_p8, %p2889_p12 }
 0x3f3   : > { %p2892_p11 = pnand %p2891_p4, %p2885_p9 }
 0x3f5   : > { %2895 = shalt.err (!%p2892_p11)
}
 0x3f6   : > { %2430 = dma.vmem_to_hbm [thread:$0]  (%p4291_p0), %s4130_s9, 2048, %s4128_s17, %s1723_s30, %s3013_s10, %s3013_s10, %s3014_s16  }
 0x3f7   : > { %1708 = vst [vmem:[%s4050_s8 + $0x78] sm:$0xff] %v1656_v32  ;;  %s2896_s21 = scalar_lea.vmem %s4139_s24, 2048  ;;  %s3016_s15 = smov [#allocation20]  }
 0x3f8   : > { %p2897_p13 = scmp.ne.s32.totalorder %s4139_s24, %s2896_s21  ;;  %s2900_s19 = sshll.u32 %s3016_s15, 4  ;;  %s2901_s19 = int_to_ptr.vmem [resolvable:$false] %s2900_s19 }
 0x3f9   : > { %s2902_s13 = scalar_lea.vmem %s2901_s19, 4096  ;;  %p2903_p3 = scmp.lt.s32.totalorder %s4139_s24, %s2901_s19 }
 0x3fa   : > { %p2898_p6 = pnand %p2897_p13, %p4291_p0  ;;  %p2904_p2 = scmp.lt.s32.totalorder %s2902_s13, %s2896_s21 }
 0x3fc   : > { %p2899_p5 = pneg %p2898_p6  ;;  %p2905_p7 = por %p2904_p2, %p2903_p3 }
 0x3fe   : > { %p2906_p9 = pnand %p2905_p7, %p2899_p5 }
 0x400   : > { %2909 = shalt.err (!%p2906_p9)
}
 0x401   : > { %s2910_s8 = scalar_lea.hbm %s4137_s26, 2048  ;;  %s2914_s22 = scalar_lea.hbm %s4294_s3, 4096 }
 0x402   : > { %p2911_p1 = scmp.ne.s32.totalorder %s4137_s26, %s2910_s8  ;;  %p2915_p8 = scmp.lt.u32.totalorder %s4137_s26, %s4294_s3 }
 0x403   : > { %p2916_p4 = scmp.lt.u32.totalorder %s2914_s22, %s2910_s8  ;;  %p2918_p13 = scmp.lt.u32.totalorder %s2910_s8, %s4137_s26 }
 0x404   : > { %p2912_p10 = pnand %p2911_p1, %p4291_p0 }
 0x405   : > { %p2917_p11 = por %p2916_p4, %p2915_p8 }
 0x406   : > { %p2913_p12 = pneg %p2912_p10 }
 0x407   : > { %p2919_p6 = por %p2918_p13, %p2917_p11 }
 0x409   : > { %p2920_p5 = pnand %p2919_p6, %p2913_p12 }
 0x40b   : > { %2923 = shalt.err (!%p2920_p5)
}
 0x40c   : > { %2431 = dma.vmem_to_hbm [thread:$0]  (%p4291_p0), %s4139_s24, 2048, %s4137_s26, %s1723_s30, %s3013_s10, %s3013_s10, %s3014_s16  }
 0x40d PF: > { %s4295_s14 = sld [smem:[#allocation33_spill]]  ;;  %s4296_s11 = sld [smem:[#allocation38_spill]] }
 0x40e   : > { %p4298_p2 = scmp.ge.s32.totalorder %s2994_s20, 2 }
 0x413   : > { %s1812_s21 = sand.u32 1, %s4295_s14   ;;  %p4297_p3 = scmp.ne.s32.totalorder %s4296_s11, 0 }
 0x414   : > { %s1813_s15 = scalar_lea.sflag [#allocation4], %s1812_s21 }
 0x415   : > { %p2464_p7 = pnand %p4298_p2, %p4297_p3 }
 0x417   : > { %2969 = dma.done.wait (!%p2464_p7), %s1813_s15, 1024  }
 0x418   : > { %2971 = vsyncadd (!%p2464_p7), %s1813_s15, 4294966272  ;;  %s4299_s23 = sadd.s32 4294967294, %s2994_s20  }
 0x419   : > { %s1821_s19 = sand.u32 1, %s4299_s23  }
 0x41a   : > { %s1822_s13 = scalar_lea.sflag [#allocation19], %s1821_s19 }
 0x41b   : > { %2973 = dma.done.wait (!%p2464_p7), %s1822_s13, 4096  }
 0x41c   : > { %2975 = vsyncadd (!%p2464_p7), %s1822_s13, 4294963200  ;;  %s1840_s27 = scalar_lea.sflag [#allocation22], %s1812_s21 }
 0x41d   : > { %2977 = dma.done.wait (!%p2464_p7), %s1840_s27, 2048  }
 0x41e   : > { %2979 = vsyncadd (!%p2464_p7), %s1840_s27, 4294965248  ;;  %s4300_s20 = sld [smem:[#allocation35_spill]]  ;;  %s4301_s10 = sld [smem:[#allocation34_spill]] }
 0x41f   : > { %s4302_s19 = sld [smem:[#allocation36_spill]]  ;;  %s4303_s17 = smov %s2986_s18 }
 0x424   : > { %p42_p0 = scmp.ge.s32.totalorder %s4300_s20, 4   ;;  %s4304_s18 = smov %s4301_s10 }
 0x426   :  { %44 = sbr.rel (!%p42_p0) target bundleno = 24 (0x18), region = 209 }
 0x42d   :  { %1845 = vsyncpa [#allocation3], 1 }
 0x42e   :  { %1847 = vsyncpa [#allocation3 + $0x1], 1 }
 0x42f   :  { %1848 = vsyncpa [#allocation10], 1 }
 0x430   :  { %1850 = vsyncpa [#allocation10 + $0x1], 1 }
 0x431   :  { %1851 = vsyncpa [#allocation13], 1 }
 0x432   :  { %1853 = vsyncpa [#allocation13 + $0x1], 1 }
 0x433   :  { %1854 = vsyncpa [#allocation16], 1 }
 0x434   :  { %1856 = vsyncpa [#allocation16 + $0x1], 1 }
 0x435   :  { %1857 = vsyncpa [#allocation4], 1 }
 0x436   :  { %1859 = vsyncpa [#allocation4 + $0x1], 1 }
 0x437   :  { %1860 = vsyncpa [#allocation19], 1 }
 0x438   :  { %1862 = vsyncpa [#allocation19 + $0x1], 1 }
 0x439   :  { %1863 = vsyncpa [#allocation22], 1 }
 0x43a   :  { %1865 = vsyncpa [#allocation22 + $0x1], 1 }
 0x43b   :  { %1866 = vsyncpa [#allocation5], 1 }
 0x43c   :  { %1868 = vsyncpa [#allocation5 + $0x1], 1 }
 0x43d   :  { %1869 = vsyncpa [#allocation7], 1 }

</bundles_post_ra>
